<compile_context>
chip_gen: v5e
topology: v5e:2x2
jax: 0.10.0
libtpu: 0.0.40
codegen_flags: <defaults>
</compile_context>

<pallas_src>
import functools

import jax
import jax.numpy as jnp
from jax import lax
from jax.experimental import pallas as pl
from jax.experimental.pallas import tpu as pltpu

BN_EPS = 1e-5


def _image_to_token_kernel(xph_ref, w_ref, bias_ref, gamma_ref, beta_ref, out_ref,
                           *, N, C, K, stride, Ho, Wo, Hp, Wp, O):
    """Fused conv(stride) + training-mode BatchNorm + MaxPool2d(3,2,1) for the whole batch.

    xph_ref:   (stride*stride, N, Hh, Wh, C) bf16  -- phase-split zero-padded input
    w_ref:     (K*K*C, o_pad) bf16                  -- im2col weight matrix
    bias_ref:  (1, o_pad) f32
    gamma_ref: (1, o_pad) f32
    beta_ref:  (1, o_pad) f32
    out_ref:   (N, Hp, Wp, O) f32
    """
    rows = N * Ho * Wo

    # HBM traffic stays bf16; upcast once in VMEM so the assembly below works on
    # plain (8,128)-tiled f32 values.
    xph = xph_ref[...].astype(jnp.float32)            # (s*s, N, Hh, Wh, C)
    w = w_ref[...]                                    # (K*K*C, o_pad) bf16

    # ---- on-chip im2col: K*K unit-stride phase taps, concatenated along lanes ----
    # Tap (kh, kw) lives in phase (kh % s, kw % s) at offset (kh // s, kw // s).
    taps = []
    for kh in range(K):
        for kw in range(K):
            p = (kh % stride) * stride + (kw % stride)
            oh, ow = kh // stride, kw // stride
            taps.append(xph[p, :, oh:oh + Ho, ow:ow + Wo, :])        # (N, Ho, Wo, C)
    lhs4 = jnp.concatenate(taps, axis=-1)                            # (N, Ho, Wo, K*K*C)

    # Flatten (N, Ho, Wo) -> rows via tile-aligned sublane concatenation (avoids a
    # second-minor-dim reshape); each piece is a full (Wo, K*K*C) slab.
    lhs = jnp.concatenate(
        [lhs4[n, i] for n in range(N) for i in range(Ho)], axis=0)   # (rows, K*K*C)

    # ---- one MXU matmul, contraction depth K*K*C, f32 accumulation ----
    y = jnp.dot(lhs.astype(jnp.bfloat16), w,
                preferred_element_type=jnp.float32)                  # (rows, o_pad)
    y = y + bias_ref[...]                                            # conv bias

    # ---- training-mode BatchNorm over the whole batch (two-pass variance) ----
    inv_cnt = 1.0 / float(rows)
    mean = jnp.sum(y, axis=0, keepdims=True) * inv_cnt               # (1, o_pad)
    cen = y - mean
    var = jnp.sum(cen * cen, axis=0, keepdims=True) * inv_cnt        # biased (training)
    scale = gamma_ref[...] * lax.rsqrt(var + BN_EPS)
    ybn = cen * scale + beta_ref[...]                                # (rows, o_pad) f32

    # ---- MaxPool2d(kernel=3, stride=2, padding=1) on the (rows, o_pad) slab ----
    # row index = n*Ho*Wo + i*Wo + j; every vertical tap is a tile-aligned Wo-row slice.
    # Out-of-range taps (the -1 padding row/col) are simply dropped -> no -inf scratch.
    for n in range(N):
        for hp in range(Hp):
            vmax = None
            for i in (2 * hp - 1, 2 * hp, 2 * hp + 1):
                if 0 <= i < Ho:
                    base = n * Ho * Wo + i * Wo
                    blk = ybn[base:base + Wo, :]                     # (Wo, o_pad)
                    vmax = blk if vmax is None else jnp.maximum(vmax, blk)
            pieces = []
            for wp in range(Wp):
                hmax = None
                for j in (2 * wp - 1, 2 * wp, 2 * wp + 1):
                    if 0 <= j < Wo:
                        row = vmax[j:j + 1, :]                       # (1, o_pad)
                        hmax = row if hmax is None else jnp.maximum(hmax, row)
                pieces.append(hmax)
            pooled = jnp.concatenate(pieces, axis=0)                 # (Wp, o_pad)
            out_ref[n, hp, :, :] = pooled[:, :O]                     # real channels only


def image_to_token_forward(x_nchw, conv_w, conv_b, bn_gamma, bn_beta,
                           kernel_size, stride):
    N, C, H, W = x_nchw.shape
    O = conv_w.shape[0]
    K, s = kernel_size, stride
    pad = (K - 1) // 2
    Ho = (H + 2 * pad - K) // s + 1
    Wo = (W + 2 * pad - K) // s + 1
    Hp = (Ho + 2 - 3) // 2 + 1
    Wp = (Wo + 2 - 3) // 2 + 1
    o_pad = ((O + 127) // 128) * 128                 # lane-dense channel dim for the MXU

    # Phase-grid sizes: tap (kh, kw) reads phase[(kh%s, kw%s)] at offset (kh//s, kw//s).
    Hh = Ho + (K - 1) // s
    Wh = Wo + (K - 1) // s

    # NCHW -> NHWC bf16; zero-pad spatially to exactly (s*Hh, s*Wh) (covers every tap).
    x = jnp.transpose(x_nchw, (0, 2, 3, 1)).astype(jnp.bfloat16)
    xp = jnp.pad(x, ((0, 0),
                     (pad, max(0, s * Hh - H - pad)),
                     (pad, max(0, s * Wh - W - pad)),
                     (0, 0)))
    xp = xp[:, :s * Hh, :s * Wh, :]
    # s x s phase split (space-to-depth, ~1x traffic): phase p = ph*s + pw.
    xph = jnp.stack([xp[:, ph::s, pw::s, :] for ph in range(s) for pw in range(s)],
                    axis=0)                           # (s*s, N, Hh, Wh, C)

    # Torch conv weight (O, C, K, K) -> im2col matrix (K*K*C, o_pad), rows in (kh,kw,c)
    # order to match the in-kernel lane concatenation order.
    w = jnp.transpose(conv_w, (2, 3, 1, 0)).reshape(K * K * C, O)
    w = jnp.pad(w, ((0, 0), (0, o_pad - O))).astype(jnp.bfloat16)

    bias = jnp.pad(conv_b.astype(jnp.float32), (0, o_pad - O)).reshape(1, o_pad)
    gamma = jnp.pad(bn_gamma.astype(jnp.float32), (0, o_pad - O)).reshape(1, o_pad)
    beta = jnp.pad(bn_beta.astype(jnp.float32), (0, o_pad - O)).reshape(1, o_pad)

    kernel = functools.partial(_image_to_token_kernel, N=N, C=C, K=K, stride=s,
                               Ho=Ho, Wo=Wo, Hp=Hp, Wp=Wp, O=O)

    # Single un-gridded invocation: all operands fit comfortably in VMEM at these shapes,
    # which removes the y HBM round-trip, the second launch and the XLA stats reduction.
    pooled = pl.pallas_call(
        kernel,
        out_shape=jax.ShapeDtypeStruct((N, Hp, Wp, O), jnp.float32),
        compiler_params=pltpu.CompilerParams(vmem_limit_bytes=32 * 1024 * 1024),
    )(xph, w, bias, gamma, beta)

    # NCHW to match the PyTorch module contract.
    # TODO(synk): downstream consumers that accept NHWC can skip this final transpose.
    return jnp.transpose(pooled, (0, 3, 1, 2))


def _reference_forward(x_nchw, conv_w, conv_b, bn_gamma, bn_beta, kernel_size, stride):
    """Pure-JAX reference (conv + bias -> training-mode BN -> maxpool), NCHW output."""
    K = kernel_size
    pad = (K - 1) // 2
    x = jnp.transpose(x_nchw, (0, 2, 3, 1)).astype(jnp.float32)
    w = jnp.transpose(conv_w, (2, 3, 1, 0)).astype(jnp.float32)     # HWIO
    y = lax.conv_general_dilated(
        x, w, window_strides=(stride, stride),
        padding=((pad, pad), (pad, pad)),
        dimension_numbers=("NHWC", "HWIO", "NHWC"))
    y = y + conv_b.reshape(1, 1, 1, -1)
    mean = jnp.mean(y, axis=(0, 1, 2), keepdims=True)
    var = jnp.mean((y - mean) ** 2, axis=(0, 1, 2), keepdims=True)
    y = (y - mean) * lax.rsqrt(var + BN_EPS) * bn_gamma.reshape(1, 1, 1, -1) \
        + bn_beta.reshape(1, 1, 1, -1)
    y = lax.reduce_window(y, -jnp.inf, lax.max,
                          window_dimensions=(1, 3, 3, 1),
                          window_strides=(1, 2, 2, 1),
                          padding=((0, 0), (1, 1), (1, 1), (0, 0)))
    return jnp.transpose(y, (0, 3, 1, 2))


if __name__ == "__main__":
    # ImageToToken(in_channels=4, out_channels=32, kernel_size=3, stride=2)
    N, C, H, W = 2, 4, 16, 16
    O, K, STRIDE = 32, 3, 2

    key = jax.random.PRNGKey(0)
    k_x, k_w, k_b = jax.random.split(key, 3)
    x = jax.random.normal(k_x, (N, C, H, W), dtype=jnp.float32)
    conv_w = 0.1 * jax.random.normal(k_w, (O, C, K, K), dtype=jnp.float32)
    conv_b = 0.05 * jax.random.normal(k_b, (O,), dtype=jnp.float32)
    bn_gamma = jnp.ones((O,), dtype=jnp.float32)     # BatchNorm2d default init
    bn_beta = jnp.zeros((O,), dtype=jnp.float32)

    fwd = jax.jit(functools.partial(image_to_token_forward,
                                    kernel_size=K, stride=STRIDE))
    out = jax.block_until_ready(fwd(x, conv_w, conv_b, bn_gamma, bn_beta))

    assert out.shape == (N, O, 4, 4), out.shape
    assert bool(jnp.all(jnp.isfinite(out)))

    ref = _reference_forward(x, conv_w, conv_b, bn_gamma, bn_beta, K, STRIDE)
    max_err = float(jnp.max(jnp.abs(out - ref)))
    assert max_err < 6e-2, f"max abs error vs reference: {max_err}"
    print("KERNEL_OK")
</pallas_src>

<mosaic_0001>
module attributes {stable_mosaic.version = 11 : i64} {
  func.func @_image_to_token_kernel(%arg0: memref<4x2x9x9x4xbf16, #tpu.memory_space<vmem>>, %arg1: memref<36x128xbf16, #tpu.memory_space<vmem>>, %arg2: memref<1x128xf32, #tpu.memory_space<vmem>>, %arg3: memref<1x128xf32, #tpu.memory_space<vmem>>, %arg4: memref<1x128xf32, #tpu.memory_space<vmem>>, %arg5: memref<2x4x4x32xf32, #tpu.memory_space<vmem>>) attributes {dimension_semantics = [], scalar_prefetch = 0 : i64, scratch_operands = 0 : i64, tpu.core_type = #tpu.core_type<tc>} {
    %c0 = arith.constant 0 : index
    %c0_0 = arith.constant 0 : index
    %c0_1 = arith.constant 0 : index
    %c0_2 = arith.constant 0 : index
    %c0_3 = arith.constant 0 : index
    %0 = vector.load %arg0[%c0, %c0_0, %c0_1, %c0_2, %c0_3] : memref<4x2x9x9x4xbf16, #tpu.memory_space<vmem>>, vector<4x2x9x9x4xbf16>
    %1 = arith.extf %0 : vector<4x2x9x9x4xbf16> to vector<4x2x9x9x4xf32>
    %c0_4 = arith.constant 0 : index
    %c0_5 = arith.constant 0 : index
    %2 = vector.load %arg1[%c0_4, %c0_5] : memref<36x128xbf16, #tpu.memory_space<vmem>>, vector<36x128xbf16>
    %3 = vector.extract_strided_slice %1 {offsets = [0, 0, 0, 0, 0], sizes = [1, 2, 8, 8, 4], strides = [1, 1, 1, 1, 1]} : vector<4x2x9x9x4xf32> to vector<1x2x8x8x4xf32>
    %4 = vector.shape_cast %3 : vector<1x2x8x8x4xf32> to vector<2x8x8x4xf32>
    %5 = vector.extract_strided_slice %1 {offsets = [1, 0, 0, 0, 0], sizes = [1, 2, 8, 8, 4], strides = [1, 1, 1, 1, 1]} : vector<4x2x9x9x4xf32> to vector<1x2x8x8x4xf32>
    %6 = vector.shape_cast %5 : vector<1x2x8x8x4xf32> to vector<2x8x8x4xf32>
    %7 = vector.extract_strided_slice %1 {offsets = [0, 0, 0, 1, 0], sizes = [1, 2, 8, 8, 4], strides = [1, 1, 1, 1, 1]} : vector<4x2x9x9x4xf32> to vector<1x2x8x8x4xf32>
    %8 = vector.shape_cast %7 : vector<1x2x8x8x4xf32> to vector<2x8x8x4xf32>
    %9 = vector.extract_strided_slice %1 {offsets = [2, 0, 0, 0, 0], sizes = [1, 2, 8, 8, 4], strides = [1, 1, 1, 1, 1]} : vector<4x2x9x9x4xf32> to vector<1x2x8x8x4xf32>
    %10 = vector.shape_cast %9 : vector<1x2x8x8x4xf32> to vector<2x8x8x4xf32>
    %11 = vector.extract_strided_slice %1 {offsets = [3, 0, 0, 0, 0], sizes = [1, 2, 8, 8, 4], strides = [1, 1, 1, 1, 1]} : vector<4x2x9x9x4xf32> to vector<1x2x8x8x4xf32>
    %12 = vector.shape_cast %11 : vector<1x2x8x8x4xf32> to vector<2x8x8x4xf32>
    %13 = vector.extract_strided_slice %1 {offsets = [2, 0, 0, 1, 0], sizes = [1, 2, 8, 8, 4], strides = [1, 1, 1, 1, 1]} : vector<4x2x9x9x4xf32> to vector<1x2x8x8x4xf32>
    %14 = vector.shape_cast %13 : vector<1x2x8x8x4xf32> to vector<2x8x8x4xf32>
    %15 = vector.extract_strided_slice %1 {offsets = [0, 0, 1, 0, 0], sizes = [1, 2, 8, 8, 4], strides = [1, 1, 1, 1, 1]} : vector<4x2x9x9x4xf32> to vector<1x2x8x8x4xf32>
    %16 = vector.shape_cast %15 : vector<1x2x8x8x4xf32> to vector<2x8x8x4xf32>
    %17 = vector.extract_strided_slice %1 {offsets = [1, 0, 1, 0, 0], sizes = [1, 2, 8, 8, 4], strides = [1, 1, 1, 1, 1]} : vector<4x2x9x9x4xf32> to vector<1x2x8x8x4xf32>
    %18 = vector.shape_cast %17 : vector<1x2x8x8x4xf32> to vector<2x8x8x4xf32>
    %19 = vector.extract_strided_slice %1 {offsets = [0, 0, 1, 1, 0], sizes = [1, 2, 8, 8, 4], strides = [1, 1, 1, 1, 1]} : vector<4x2x9x9x4xf32> to vector<1x2x8x8x4xf32>
    %20 = vector.shape_cast %19 : vector<1x2x8x8x4xf32> to vector<2x8x8x4xf32>
    %21 = tpu.concatenate %4, %6, %8, %10, %12, %14, %16, %18, %20 in 3 : vector<2x8x8x4xf32>, vector<2x8x8x4xf32>, vector<2x8x8x4xf32>, vector<2x8x8x4xf32>, vector<2x8x8x4xf32>, vector<2x8x8x4xf32>, vector<2x8x8x4xf32>, vector<2x8x8x4xf32>, vector<2x8x8x4xf32> -> vector<2x8x8x36xf32>
    %22 = vector.extract_strided_slice %21 {offsets = [0, 0, 0, 0], sizes = [1, 1, 8, 36], strides = [1, 1, 1, 1]} : vector<2x8x8x36xf32> to vector<1x1x8x36xf32>
    %23 = vector.shape_cast %22 : vector<1x1x8x36xf32> to vector<8x36xf32>
    %24 = vector.extract_strided_slice %21 {offsets = [0, 1, 0, 0], sizes = [1, 1, 8, 36], strides = [1, 1, 1, 1]} : vector<2x8x8x36xf32> to vector<1x1x8x36xf32>
    %25 = vector.shape_cast %24 : vector<1x1x8x36xf32> to vector<8x36xf32>
    %26 = vector.extract_strided_slice %21 {offsets = [0, 2, 0, 0], sizes = [1, 1, 8, 36], strides = [1, 1, 1, 1]} : vector<2x8x8x36xf32> to vector<1x1x8x36xf32>
    %27 = vector.shape_cast %26 : vector<1x1x8x36xf32> to vector<8x36xf32>
    %28 = vector.extract_strided_slice %21 {offsets = [0, 3, 0, 0], sizes = [1, 1, 8, 36], strides = [1, 1, 1, 1]} : vector<2x8x8x36xf32> to vector<1x1x8x36xf32>
    %29 = vector.shape_cast %28 : vector<1x1x8x36xf32> to vector<8x36xf32>
    %30 = vector.extract_strided_slice %21 {offsets = [0, 4, 0, 0], sizes = [1, 1, 8, 36], strides = [1, 1, 1, 1]} : vector<2x8x8x36xf32> to vector<1x1x8x36xf32>
    %31 = vector.shape_cast %30 : vector<1x1x8x36xf32> to vector<8x36xf32>
    %32 = vector.extract_strided_slice %21 {offsets = [0, 5, 0, 0], sizes = [1, 1, 8, 36], strides = [1, 1, 1, 1]} : vector<2x8x8x36xf32> to vector<1x1x8x36xf32>
    %33 = vector.shape_cast %32 : vector<1x1x8x36xf32> to vector<8x36xf32>
    %34 = vector.extract_strided_slice %21 {offsets = [0, 6, 0, 0], sizes = [1, 1, 8, 36], strides = [1, 1, 1, 1]} : vector<2x8x8x36xf32> to vector<1x1x8x36xf32>
    %35 = vector.shape_cast %34 : vector<1x1x8x36xf32> to vector<8x36xf32>
    %36 = vector.extract_strided_slice %21 {offsets = [0, 7, 0, 0], sizes = [1, 1, 8, 36], strides = [1, 1, 1, 1]} : vector<2x8x8x36xf32> to vector<1x1x8x36xf32>
    %37 = vector.shape_cast %36 : vector<1x1x8x36xf32> to vector<8x36xf32>
    %38 = vector.extract_strided_slice %21 {offsets = [1, 0, 0, 0], sizes = [1, 1, 8, 36], strides = [1, 1, 1, 1]} : vector<2x8x8x36xf32> to vector<1x1x8x36xf32>
    %39 = vector.shape_cast %38 : vector<1x1x8x36xf32> to vector<8x36xf32>
    %40 = vector.extract_strided_slice %21 {offsets = [1, 1, 0, 0], sizes = [1, 1, 8, 36], strides = [1, 1, 1, 1]} : vector<2x8x8x36xf32> to vector<1x1x8x36xf32>
    %41 = vector.shape_cast %40 : vector<1x1x8x36xf32> to vector<8x36xf32>
    %42 = vector.extract_strided_slice %21 {offsets = [1, 2, 0, 0], sizes = [1, 1, 8, 36], strides = [1, 1, 1, 1]} : vector<2x8x8x36xf32> to vector<1x1x8x36xf32>
    %43 = vector.shape_cast %42 : vector<1x1x8x36xf32> to vector<8x36xf32>
    %44 = vector.extract_strided_slice %21 {offsets = [1, 3, 0, 0], sizes = [1, 1, 8, 36], strides = [1, 1, 1, 1]} : vector<2x8x8x36xf32> to vector<1x1x8x36xf32>
    %45 = vector.shape_cast %44 : vector<1x1x8x36xf32> to vector<8x36xf32>
    %46 = vector.extract_strided_slice %21 {offsets = [1, 4, 0, 0], sizes = [1, 1, 8, 36], strides = [1, 1, 1, 1]} : vector<2x8x8x36xf32> to vector<1x1x8x36xf32>
    %47 = vector.shape_cast %46 : vector<1x1x8x36xf32> to vector<8x36xf32>
    %48 = vector.extract_strided_slice %21 {offsets = [1, 5, 0, 0], sizes = [1, 1, 8, 36], strides = [1, 1, 1, 1]} : vector<2x8x8x36xf32> to vector<1x1x8x36xf32>
    %49 = vector.shape_cast %48 : vector<1x1x8x36xf32> to vector<8x36xf32>
    %50 = vector.extract_strided_slice %21 {offsets = [1, 6, 0, 0], sizes = [1, 1, 8, 36], strides = [1, 1, 1, 1]} : vector<2x8x8x36xf32> to vector<1x1x8x36xf32>
    %51 = vector.shape_cast %50 : vector<1x1x8x36xf32> to vector<8x36xf32>
    %52 = vector.extract_strided_slice %21 {offsets = [1, 7, 0, 0], sizes = [1, 1, 8, 36], strides = [1, 1, 1, 1]} : vector<2x8x8x36xf32> to vector<1x1x8x36xf32>
    %53 = vector.shape_cast %52 : vector<1x1x8x36xf32> to vector<8x36xf32>
    %54 = tpu.concatenate %23, %25, %27, %29, %31, %33, %35, %37, %39, %41, %43, %45, %47, %49, %51, %53 in 0 : vector<8x36xf32>, vector<8x36xf32>, vector<8x36xf32>, vector<8x36xf32>, vector<8x36xf32>, vector<8x36xf32>, vector<8x36xf32>, vector<8x36xf32>, vector<8x36xf32>, vector<8x36xf32>, vector<8x36xf32>, vector<8x36xf32>, vector<8x36xf32>, vector<8x36xf32>, vector<8x36xf32>, vector<8x36xf32> -> vector<128x36xf32>
    %55 = arith.truncf %54 : vector<128x36xf32> to vector<128x36xbf16>
    %cst = arith.constant dense<0.000000e+00> : vector<128x128xf32>
    %56 = tpu.matmul %55, %2, %cst {dimension_numbers = #tpu.dot_dimension_numbers<[1], [0], [0], [1], [0, 0, 1, 1], [], []>} : vector<128x36xbf16>, vector<36x128xbf16>, vector<128x128xf32> -> vector<128x128xf32>
    %c0_6 = arith.constant 0 : index
    %c0_7 = arith.constant 0 : index
    %57 = vector.load %arg2[%c0_6, %c0_7] : memref<1x128xf32, #tpu.memory_space<vmem>>, vector<1x128xf32>
    %58 = vector.broadcast %57 : vector<1x128xf32> to vector<128x128xf32>
    %59 = arith.addf %56, %58 : vector<128x128xf32>
    %cst_8 = arith.constant dense<0.000000e+00> : vector<128xf32>
    %60 = vector.multi_reduction <add>, %59, %cst_8 [0] : vector<128x128xf32> to vector<128xf32>
    %61 = vector.shape_cast %60 : vector<128xf32> to vector<1x128xf32>
    %cst_9 = arith.constant 7.812500e-03 : f32
    %62 = vector.broadcast %cst_9 : f32 to vector<1x128xf32>
    %63 = arith.mulf %61, %62 : vector<1x128xf32>
    %64 = vector.broadcast %63 : vector<1x128xf32> to vector<128x128xf32>
    %65 = arith.subf %59, %64 : vector<128x128xf32>
    %66 = arith.mulf %65, %65 : vector<128x128xf32>
    %cst_10 = arith.constant dense<0.000000e+00> : vector<128xf32>
    %67 = vector.multi_reduction <add>, %66, %cst_10 [0] : vector<128x128xf32> to vector<128xf32>
    %68 = vector.shape_cast %67 : vector<128xf32> to vector<1x128xf32>
    %cst_11 = arith.constant 7.812500e-03 : f32
    %69 = vector.broadcast %cst_11 : f32 to vector<1x128xf32>
    %70 = arith.mulf %68, %69 : vector<1x128xf32>
    %c0_12 = arith.constant 0 : index
    %c0_13 = arith.constant 0 : index
    %71 = vector.load %arg3[%c0_12, %c0_13] : memref<1x128xf32, #tpu.memory_space<vmem>>, vector<1x128xf32>
    %cst_14 = arith.constant 9.99999974E-6 : f32
    %72 = vector.broadcast %cst_14 : f32 to vector<1x128xf32>
    %73 = arith.addf %70, %72 : vector<1x128xf32>
    %74 = math.rsqrt %73 : vector<1x128xf32>
    %75 = arith.mulf %71, %74 : vector<1x128xf32>
    %76 = vector.broadcast %75 : vector<1x128xf32> to vector<128x128xf32>
    %77 = arith.mulf %65, %76 : vector<128x128xf32>
    %c0_15 = arith.constant 0 : index
    %c0_16 = arith.constant 0 : index
    %78 = vector.load %arg4[%c0_15, %c0_16] : memref<1x128xf32, #tpu.memory_space<vmem>>, vector<1x128xf32>
    %79 = vector.broadcast %78 : vector<1x128xf32> to vector<128x128xf32>
    %80 = arith.addf %77, %79 : vector<128x128xf32>
    %81 = vector.extract_strided_slice %80 {offsets = [0, 0], sizes = [8, 128], strides = [1, 1]} : vector<128x128xf32> to vector<8x128xf32>
    %82 = vector.extract_strided_slice %80 {offsets = [8, 0], sizes = [8, 128], strides = [1, 1]} : vector<128x128xf32> to vector<8x128xf32>
    %83 = arith.maximumf %81, %82 : vector<8x128xf32>
    %84 = vector.extract_strided_slice %83 {offsets = [0, 0], sizes = [1, 128], strides = [1, 1]} : vector<8x128xf32> to vector<1x128xf32>
    %85 = vector.extract_strided_slice %83 {offsets = [1, 0], sizes = [1, 128], strides = [1, 1]} : vector<8x128xf32> to vector<1x128xf32>
    %86 = arith.maximumf %84, %85 : vector<1x128xf32>
    %87 = vector.extract_strided_slice %83 {offsets = [1, 0], sizes = [1, 128], strides = [1, 1]} : vector<8x128xf32> to vector<1x128xf32>
    %88 = vector.extract_strided_slice %83 {offsets = [2, 0], sizes = [1, 128], strides = [1, 1]} : vector<8x128xf32> to vector<1x128xf32>
    %89 = arith.maximumf %87, %88 : vector<1x128xf32>
    %90 = vector.extract_strided_slice %83 {offsets = [3, 0], sizes = [1, 128], strides = [1, 1]} : vector<8x128xf32> to vector<1x128xf32>
    %91 = arith.maximumf %89, %90 : vector<1x128xf32>
    %92 = vector.extract_strided_slice %83 {offsets = [3, 0], sizes = [1, 128], strides = [1, 1]} : vector<8x128xf32> to vector<1x128xf32>
    %93 = vector.extract_strided_slice %83 {offsets = [4, 0], sizes = [1, 128], strides = [1, 1]} : vector<8x128xf32> to vector<1x128xf32>
    %94 = arith.maximumf %92, %93 : vector<1x128xf32>
    %95 = vector.extract_strided_slice %83 {offsets = [5, 0], sizes = [1, 128], strides = [1, 1]} : vector<8x128xf32> to vector<1x128xf32>
    %96 = arith.maximumf %94, %95 : vector<1x128xf32>
    %97 = vector.extract_strided_slice %83 {offsets = [5, 0], sizes = [1, 128], strides = [1, 1]} : vector<8x128xf32> to vector<1x128xf32>
    %98 = vector.extract_strided_slice %83 {offsets = [6, 0], sizes = [1, 128], strides = [1, 1]} : vector<8x128xf32> to vector<1x128xf32>
    %99 = arith.maximumf %97, %98 : vector<1x128xf32>
    %100 = vector.extract_strided_slice %83 {offsets = [7, 0], sizes = [1, 128], strides = [1, 1]} : vector<8x128xf32> to vector<1x128xf32>
    %101 = arith.maximumf %99, %100 : vector<1x128xf32>
    %102 = tpu.concatenate %86, %91, %96, %101 in 0 : vector<1x128xf32>, vector<1x128xf32>, vector<1x128xf32>, vector<1x128xf32> -> vector<4x128xf32>
    %103 = vector.extract_strided_slice %102 {offsets = [0, 0], sizes = [4, 32], strides = [1, 1]} : vector<4x128xf32> to vector<4x32xf32>
    %c0_17 = arith.constant 0 : index
    %c0_18 = arith.constant 0 : index
    %c0_19 = arith.constant 0 : index
    %c0_20 = arith.constant 0 : index
    %104 = vector.load %arg5[%c0_17, %c0_18, %c0_19, %c0_20] : memref<2x4x4x32xf32, #tpu.memory_space<vmem>>, vector<1x1x4x32xf32>
    %105 = vector.shape_cast %104 : vector<1x1x4x32xf32> to vector<4x32xf32>
    %106 = vector.shape_cast %103 : vector<4x32xf32> to vector<1x1x4x32xf32>
    tpu.vector_store %arg5[%c0_17, %c0_18, %c0_19, %c0_20], %106 {strides = array<i32>} : memref<2x4x4x32xf32, #tpu.memory_space<vmem>>, vector<1x1x4x32xf32>,
    %107 = vector.extract_strided_slice %80 {offsets = [8, 0], sizes = [8, 128], strides = [1, 1]} : vector<128x128xf32> to vector<8x128xf32>
    %108 = vector.extract_strided_slice %80 {offsets = [16, 0], sizes = [8, 128], strides = [1, 1]} : vector<128x128xf32> to vector<8x128xf32>
    %109 = arith.maximumf %107, %108 : vector<8x128xf32>
    %110 = vector.extract_strided_slice %80 {offsets = [24, 0], sizes = [8, 128], strides = [1, 1]} : vector<128x128xf32> to vector<8x128xf32>
    %111 = arith.maximumf %109, %110 : vector<8x128xf32>
    %112 = vector.extract_strided_slice %111 {offsets = [0, 0], sizes = [1, 128], strides = [1, 1]} : vector<8x128xf32> to vector<1x128xf32>
    %113 = vector.extract_strided_slice %111 {offsets = [1, 0], sizes = [1, 128], strides = [1, 1]} : vector<8x128xf32> to vector<1x128xf32>
    %114 = arith.maximumf %112, %113 : vector<1x128xf32>
    %115 = vector.extract_strided_slice %111 {offsets = [1, 0], sizes = [1, 128], strides = [1, 1]} : vector<8x128xf32> to vector<1x128xf32>
    %116 = vector.extract_strided_slice %111 {offsets = [2, 0], sizes = [1, 128], strides = [1, 1]} : vector<8x128xf32> to vector<1x128xf32>
    %117 = arith.maximumf %115, %116 : vector<1x128xf32>
    %118 = vector.extract_strided_slice %111 {offsets = [3, 0], sizes = [1, 128], strides = [1, 1]} : vector<8x128xf32> to vector<1x128xf32>
    %119 = arith.maximumf %117, %118 : vector<1x128xf32>
    %120 = vector.extract_strided_slice %111 {offsets = [3, 0], sizes = [1, 128], strides = [1, 1]} : vector<8x128xf32> to vector<1x128xf32>
    %121 = vector.extract_strided_slice %111 {offsets = [4, 0], sizes = [1, 128], strides = [1, 1]} : vector<8x128xf32> to vector<1x128xf32>
    %122 = arith.maximumf %120, %121 : vector<1x128xf32>
    %123 = vector.extract_strided_slice %111 {offsets = [5, 0], sizes = [1, 128], strides = [1, 1]} : vector<8x128xf32> to vector<1x128xf32>
    %124 = arith.maximumf %122, %123 : vector<1x128xf32>
    %125 = vector.extract_strided_slice %111 {offsets = [5, 0], sizes = [1, 128], strides = [1, 1]} : vector<8x128xf32> to vector<1x128xf32>
    %126 = vector.extract_strided_slice %111 {offsets = [6, 0], sizes = [1, 128], strides = [1, 1]} : vector<8x128xf32> to vector<1x128xf32>
    %127 = arith.maximumf %125, %126 : vector<1x128xf32>
    %128 = vector.extract_strided_slice %111 {offsets = [7, 0], sizes = [1, 128], strides = [1, 1]} : vector<8x128xf32> to vector<1x128xf32>
    %129 = arith.maximumf %127, %128 : vector<1x128xf32>
    %130 = tpu.concatenate %114, %119, %124, %129 in 0 : vector<1x128xf32>, vector<1x128xf32>, vector<1x128xf32>, vector<1x128xf32> -> vector<4x128xf32>
    %131 = vector.extract_strided_slice %130 {offsets = [0, 0], sizes = [4, 32], strides = [1, 1]} : vector<4x128xf32> to vector<4x32xf32>
    %c0_21 = arith.constant 0 : index
    %c1 = arith.constant 1 : index
    %c0_22 = arith.constant 0 : index
    %c0_23 = arith.constant 0 : index
    %132 = vector.load %arg5[%c0_21, %c1, %c0_22, %c0_23] : memref<2x4x4x32xf32, #tpu.memory_space<vmem>>, vector<1x1x4x32xf32>
    %133 = vector.shape_cast %132 : vector<1x1x4x32xf32> to vector<4x32xf32>
    %134 = vector.shape_cast %131 : vector<4x32xf32> to vector<1x1x4x32xf32>
    tpu.vector_store %arg5[%c0_21, %c1, %c0_22, %c0_23], %134 {strides = array<i32>} : memref<2x4x4x32xf32, #tpu.memory_space<vmem>>, vector<1x1x4x32xf32>,
    %135 = vector.extract_strided_slice %80 {offsets = [24, 0], sizes = [8, 128], strides = [1, 1]} : vector<128x128xf32> to vector<8x128xf32>
    %136 = vector.extract_strided_slice %80 {offsets = [32, 0], sizes = [8, 128], strides = [1, 1]} : vector<128x128xf32> to vector<8x128xf32>
    %137 = arith.maximumf %135, %136 : vector<8x128xf32>
    %138 = vector.extract_strided_slice %80 {offsets = [40, 0], sizes = [8, 128], strides = [1, 1]} : vector<128x128xf32> to vector<8x128xf32>
    %139 = arith.maximumf %137, %138 : vector<8x128xf32>
    %140 = vector.extract_strided_slice %139 {offsets = [0, 0], sizes = [1, 128], strides = [1, 1]} : vector<8x128xf32> to vector<1x128xf32>
    %141 = vector.extract_strided_slice %139 {offsets = [1, 0], sizes = [1, 128], strides = [1, 1]} : vector<8x128xf32> to vector<1x128xf32>
    %142 = arith.maximumf %140, %141 : vector<1x128xf32>
    %143 = vector.extract_strided_slice %139 {offsets = [1, 0], sizes = [1, 128], strides = [1, 1]} : vector<8x128xf32> to vector<1x128xf32>
    %144 = vector.extract_strided_slice %139 {offsets = [2, 0], sizes = [1, 128], strides = [1, 1]} : vector<8x128xf32> to vector<1x128xf32>
    %145 = arith.maximumf %143, %144 : vector<1x128xf32>
    %146 = vector.extract_strided_slice %139 {offsets = [3, 0], sizes = [1, 128], strides = [1, 1]} : vector<8x128xf32> to vector<1x128xf32>
    %147 = arith.maximumf %145, %146 : vector<1x128xf32>
    %148 = vector.extract_strided_slice %139 {offsets = [3, 0], sizes = [1, 128], strides = [1, 1]} : vector<8x128xf32> to vector<1x128xf32>
    %149 = vector.extract_strided_slice %139 {offsets = [4, 0], sizes = [1, 128], strides = [1, 1]} : vector<8x128xf32> to vector<1x128xf32>
    %150 = arith.maximumf %148, %149 : vector<1x128xf32>
    %151 = vector.extract_strided_slice %139 {offsets = [5, 0], sizes = [1, 128], strides = [1, 1]} : vector<8x128xf32> to vector<1x128xf32>
    %152 = arith.maximumf %150, %151 : vector<1x128xf32>
    %153 = vector.extract_strided_slice %139 {offsets = [5, 0], sizes = [1, 128], strides = [1, 1]} : vector<8x128xf32> to vector<1x128xf32>
    %154 = vector.extract_strided_slice %139 {offsets = [6, 0], sizes = [1, 128], strides = [1, 1]} : vector<8x128xf32> to vector<1x128xf32>
    %155 = arith.maximumf %153, %154 : vector<1x128xf32>
    %156 = vector.extract_strided_slice %139 {offsets = [7, 0], sizes = [1, 128], strides = [1, 1]} : vector<8x128xf32> to vector<1x128xf32>
    %157 = arith.maximumf %155, %156 : vector<1x128xf32>
    %158 = tpu.concatenate %142, %147, %152, %157 in 0 : vector<1x128xf32>, vector<1x128xf32>, vector<1x128xf32>, vector<1x128xf32> -> vector<4x128xf32>
    %159 = vector.extract_strided_slice %158 {offsets = [0, 0], sizes = [4, 32], strides = [1, 1]} : vector<4x128xf32> to vector<4x32xf32>
    %c0_24 = arith.constant 0 : index
    %c2 = arith.constant 2 : index
    %c0_25 = arith.constant 0 : index
    %c0_26 = arith.constant 0 : index
    %160 = vector.load %arg5[%c0_24, %c2, %c0_25, %c0_26] : memref<2x4x4x32xf32, #tpu.memory_space<vmem>>, vector<1x1x4x32xf32>
    %161 = vector.shape_cast %160 : vector<1x1x4x32xf32> to vector<4x32xf32>
    %162 = vector.shape_cast %159 : vector<4x32xf32> to vector<1x1x4x32xf32>
    tpu.vector_store %arg5[%c0_24, %c2, %c0_25, %c0_26], %162 {strides = array<i32>} : memref<2x4x4x32xf32, #tpu.memory_space<vmem>>, vector<1x1x4x32xf32>,
    %163 = vector.extract_strided_slice %80 {offsets = [40, 0], sizes = [8, 128], strides = [1, 1]} : vector<128x128xf32> to vector<8x128xf32>
    %164 = vector.extract_strided_slice %80 {offsets = [48, 0], sizes = [8, 128], strides = [1, 1]} : vector<128x128xf32> to vector<8x128xf32>
    %165 = arith.maximumf %163, %164 : vector<8x128xf32>
    %166 = vector.extract_strided_slice %80 {offsets = [56, 0], sizes = [8, 128], strides = [1, 1]} : vector<128x128xf32> to vector<8x128xf32>
    %167 = arith.maximumf %165, %166 : vector<8x128xf32>
    %168 = vector.extract_strided_slice %167 {offsets = [0, 0], sizes = [1, 128], strides = [1, 1]} : vector<8x128xf32> to vector<1x128xf32>
    %169 = vector.extract_strided_slice %167 {offsets = [1, 0], sizes = [1, 128], strides = [1, 1]} : vector<8x128xf32> to vector<1x128xf32>
    %170 = arith.maximumf %168, %169 : vector<1x128xf32>
    %171 = vector.extract_strided_slice %167 {offsets = [1, 0], sizes = [1, 128], strides = [1, 1]} : vector<8x128xf32> to vector<1x128xf32>
    %172 = vector.extract_strided_slice %167 {offsets = [2, 0], sizes = [1, 128], strides = [1, 1]} : vector<8x128xf32> to vector<1x128xf32>
    %173 = arith.maximumf %171, %172 : vector<1x128xf32>
    %174 = vector.extract_strided_slice %167 {offsets = [3, 0], sizes = [1, 128], strides = [1, 1]} : vector<8x128xf32> to vector<1x128xf32>
    %175 = arith.maximumf %173, %174 : vector<1x128xf32>
    %176 = vector.extract_strided_slice %167 {offsets = [3, 0], sizes = [1, 128], strides = [1, 1]} : vector<8x128xf32> to vector<1x128xf32>
    %177 = vector.extract_strided_slice %167 {offsets = [4, 0], sizes = [1, 128], strides = [1, 1]} : vector<8x128xf32> to vector<1x128xf32>
    %178 = arith.maximumf %176, %177 : vector<1x128xf32>
    %179 = vector.extract_strided_slice %167 {offsets = [5, 0], sizes = [1, 128], strides = [1, 1]} : vector<8x128xf32> to vector<1x128xf32>
    %180 = arith.maximumf %178, %179 : vector<1x128xf32>
    %181 = vector.extract_strided_slice %167 {offsets = [5, 0], sizes = [1, 128], strides = [1, 1]} : vector<8x128xf32> to vector<1x128xf32>
    %182 = vector.extract_strided_slice %167 {offsets = [6, 0], sizes = [1, 128], strides = [1, 1]} : vector<8x128xf32> to vector<1x128xf32>
    %183 = arith.maximumf %181, %182 : vector<1x128xf32>
    %184 = vector.extract_strided_slice %167 {offsets = [7, 0], sizes = [1, 128], strides = [1, 1]} : vector<8x128xf32> to vector<1x128xf32>
    %185 = arith.maximumf %183, %184 : vector<1x128xf32>
    %186 = tpu.concatenate %170, %175, %180, %185 in 0 : vector<1x128xf32>, vector<1x128xf32>, vector<1x128xf32>, vector<1x128xf32> -> vector<4x128xf32>
    %187 = vector.extract_strided_slice %186 {offsets = [0, 0], sizes = [4, 32], strides = [1, 1]} : vector<4x128xf32> to vector<4x32xf32>
    %c0_27 = arith.constant 0 : index
    %c3 = arith.constant 3 : index
    %c0_28 = arith.constant 0 : index
    %c0_29 = arith.constant 0 : index
    %188 = vector.load %arg5[%c0_27, %c3, %c0_28, %c0_29] : memref<2x4x4x32xf32, #tpu.memory_space<vmem>>, vector<1x1x4x32xf32>
    %189 = vector.shape_cast %188 : vector<1x1x4x32xf32> to vector<4x32xf32>
    %190 = vector.shape_cast %187 : vector<4x32xf32> to vector<1x1x4x32xf32>
    tpu.vector_store %arg5[%c0_27, %c3, %c0_28, %c0_29], %190 {strides = array<i32>} : memref<2x4x4x32xf32, #tpu.memory_space<vmem>>, vector<1x1x4x32xf32>,
    %191 = vector.extract_strided_slice %80 {offsets = [64, 0], sizes = [8, 128], strides = [1, 1]} : vector<128x128xf32> to vector<8x128xf32>
    %192 = vector.extract_strided_slice %80 {offsets = [72, 0], sizes = [8, 128], strides = [1, 1]} : vector<128x128xf32> to vector<8x128xf32>
    %193 = arith.maximumf %191, %192 : vector<8x128xf32>
    %194 = vector.extract_strided_slice %193 {offsets = [0, 0], sizes = [1, 128], strides = [1, 1]} : vector<8x128xf32> to vector<1x128xf32>
    %195 = vector.extract_strided_slice %193 {offsets = [1, 0], sizes = [1, 128], strides = [1, 1]} : vector<8x128xf32> to vector<1x128xf32>
    %196 = arith.maximumf %194, %195 : vector<1x128xf32>
    %197 = vector.extract_strided_slice %193 {offsets = [1, 0], sizes = [1, 128], strides = [1, 1]} : vector<8x128xf32> to vector<1x128xf32>
    %198 = vector.extract_strided_slice %193 {offsets = [2, 0], sizes = [1, 128], strides = [1, 1]} : vector<8x128xf32> to vector<1x128xf32>
    %199 = arith.maximumf %197, %198 : vector<1x128xf32>
    %200 = vector.extract_strided_slice %193 {offsets = [3, 0], sizes = [1, 128], strides = [1, 1]} : vector<8x128xf32> to vector<1x128xf32>
    %201 = arith.maximumf %199, %200 : vector<1x128xf32>
    %202 = vector.extract_strided_slice %193 {offsets = [3, 0], sizes = [1, 128], strides = [1, 1]} : vector<8x128xf32> to vector<1x128xf32>
    %203 = vector.extract_strided_slice %193 {offsets = [4, 0], sizes = [1, 128], strides = [1, 1]} : vector<8x128xf32> to vector<1x128xf32>
    %204 = arith.maximumf %202, %203 : vector<1x128xf32>
    %205 = vector.extract_strided_slice %193 {offsets = [5, 0], sizes = [1, 128], strides = [1, 1]} : vector<8x128xf32> to vector<1x128xf32>
    %206 = arith.maximumf %204, %205 : vector<1x128xf32>
    %207 = vector.extract_strided_slice %193 {offsets = [5, 0], sizes = [1, 128], strides = [1, 1]} : vector<8x128xf32> to vector<1x128xf32>
    %208 = vector.extract_strided_slice %193 {offsets = [6, 0], sizes = [1, 128], strides = [1, 1]} : vector<8x128xf32> to vector<1x128xf32>
    %209 = arith.maximumf %207, %208 : vector<1x128xf32>
    %210 = vector.extract_strided_slice %193 {offsets = [7, 0], sizes = [1, 128], strides = [1, 1]} : vector<8x128xf32> to vector<1x128xf32>
    %211 = arith.maximumf %209, %210 : vector<1x128xf32>
    %212 = tpu.concatenate %196, %201, %206, %211 in 0 : vector<1x128xf32>, vector<1x128xf32>, vector<1x128xf32>, vector<1x128xf32> -> vector<4x128xf32>
    %213 = vector.extract_strided_slice %212 {offsets = [0, 0], sizes = [4, 32], strides = [1, 1]} : vector<4x128xf32> to vector<4x32xf32>
    %c1_30 = arith.constant 1 : index
    %c0_31 = arith.constant 0 : index
    %c0_32 = arith.constant 0 : index
    %c0_33 = arith.constant 0 : index
    %214 = vector.load %arg5[%c1_30, %c0_31, %c0_32, %c0_33] : memref<2x4x4x32xf32, #tpu.memory_space<vmem>>, vector<1x1x4x32xf32>
    %215 = vector.shape_cast %214 : vector<1x1x4x32xf32> to vector<4x32xf32>
    %216 = vector.shape_cast %213 : vector<4x32xf32> to vector<1x1x4x32xf32>
    tpu.vector_store %arg5[%c1_30, %c0_31, %c0_32, %c0_33], %216 {strides = array<i32>} : memref<2x4x4x32xf32, #tpu.memory_space<vmem>>, vector<1x1x4x32xf32>,
    %217 = vector.extract_strided_slice %80 {offsets = [72, 0], sizes = [8, 128], strides = [1, 1]} : vector<128x128xf32> to vector<8x128xf32>
    %218 = vector.extract_strided_slice %80 {offsets = [80, 0], sizes = [8, 128], strides = [1, 1]} : vector<128x128xf32> to vector<8x128xf32>
    %219 = arith.maximumf %217, %218 : vector<8x128xf32>
    %220 = vector.extract_strided_slice %80 {offsets = [88, 0], sizes = [8, 128], strides = [1, 1]} : vector<128x128xf32> to vector<8x128xf32>
    %221 = arith.maximumf %219, %220 : vector<8x128xf32>
    %222 = vector.extract_strided_slice %221 {offsets = [0, 0], sizes = [1, 128], strides = [1, 1]} : vector<8x128xf32> to vector<1x128xf32>
    %223 = vector.extract_strided_slice %221 {offsets = [1, 0], sizes = [1, 128], strides = [1, 1]} : vector<8x128xf32> to vector<1x128xf32>
    %224 = arith.maximumf %222, %223 : vector<1x128xf32>
    %225 = vector.extract_strided_slice %221 {offsets = [1, 0], sizes = [1, 128], strides = [1, 1]} : vector<8x128xf32> to vector<1x128xf32>
    %226 = vector.extract_strided_slice %221 {offsets = [2, 0], sizes = [1, 128], strides = [1, 1]} : vector<8x128xf32> to vector<1x128xf32>
    %227 = arith.maximumf %225, %226 : vector<1x128xf32>
    %228 = vector.extract_strided_slice %221 {offsets = [3, 0], sizes = [1, 128], strides = [1, 1]} : vector<8x128xf32> to vector<1x128xf32>
    %229 = arith.maximumf %227, %228 : vector<1x128xf32>
    %230 = vector.extract_strided_slice %221 {offsets = [3, 0], sizes = [1, 128], strides = [1, 1]} : vector<8x128xf32> to vector<1x128xf32>
    %231 = vector.extract_strided_slice %221 {offsets = [4, 0], sizes = [1, 128], strides = [1, 1]} : vector<8x128xf32> to vector<1x128xf32>
    %232 = arith.maximumf %230, %231 : vector<1x128xf32>
    %233 = vector.extract_strided_slice %221 {offsets = [5, 0], sizes = [1, 128], strides = [1, 1]} : vector<8x128xf32> to vector<1x128xf32>
    %234 = arith.maximumf %232, %233 : vector<1x128xf32>
    %235 = vector.extract_strided_slice %221 {offsets = [5, 0], sizes = [1, 128], strides = [1, 1]} : vector<8x128xf32> to vector<1x128xf32>
    %236 = vector.extract_strided_slice %221 {offsets = [6, 0], sizes = [1, 128], strides = [1, 1]} : vector<8x128xf32> to vector<1x128xf32>
    %237 = arith.maximumf %235, %236 : vector<1x128xf32>
    %238 = vector.extract_strided_slice %221 {offsets = [7, 0], sizes = [1, 128], strides = [1, 1]} : vector<8x128xf32> to vector<1x128xf32>
    %239 = arith.maximumf %237, %238 : vector<1x128xf32>
    %240 = tpu.concatenate %224, %229, %234, %239 in 0 : vector<1x128xf32>, vector<1x128xf32>, vector<1x128xf32>, vector<1x128xf32> -> vector<4x128xf32>
    %241 = vector.extract_strided_slice %240 {offsets = [0, 0], sizes = [4, 32], strides = [1, 1]} : vector<4x128xf32> to vector<4x32xf32>
    %c1_34 = arith.constant 1 : index
    %c1_35 = arith.constant 1 : index
    %c0_36 = arith.constant 0 : index
    %c0_37 = arith.constant 0 : index
    %242 = vector.load %arg5[%c1_34, %c1_35, %c0_36, %c0_37] : memref<2x4x4x32xf32, #tpu.memory_space<vmem>>, vector<1x1x4x32xf32>
    %243 = vector.shape_cast %242 : vector<1x1x4x32xf32> to vector<4x32xf32>
    %244 = vector.shape_cast %241 : vector<4x32xf32> to vector<1x1x4x32xf32>
    tpu.vector_store %arg5[%c1_34, %c1_35, %c0_36, %c0_37], %244 {strides = array<i32>} : memref<2x4x4x32xf32, #tpu.memory_space<vmem>>, vector<1x1x4x32xf32>,
    %245 = vector.extract_strided_slice %80 {offsets = [88, 0], sizes = [8, 128], strides = [1, 1]} : vector<128x128xf32> to vector<8x128xf32>
    %246 = vector.extract_strided_slice %80 {offsets = [96, 0], sizes = [8, 128], strides = [1, 1]} : vector<128x128xf32> to vector<8x128xf32>
    %247 = arith.maximumf %245, %246 : vector<8x128xf32>
    %248 = vector.extract_strided_slice %80 {offsets = [104, 0], sizes = [8, 128], strides = [1, 1]} : vector<128x128xf32> to vector<8x128xf32>
    %249 = arith.maximumf %247, %248 : vector<8x128xf32>
    %250 = vector.extract_strided_slice %249 {offsets = [0, 0], sizes = [1, 128], strides = [1, 1]} : vector<8x128xf32> to vector<1x128xf32>
    %251 = vector.extract_strided_slice %249 {offsets = [1, 0], sizes = [1, 128], strides = [1, 1]} : vector<8x128xf32> to vector<1x128xf32>
    %252 = arith.maximumf %250, %251 : vector<1x128xf32>
    %253 = vector.extract_strided_slice %249 {offsets = [1, 0], sizes = [1, 128], strides = [1, 1]} : vector<8x128xf32> to vector<1x128xf32>
    %254 = vector.extract_strided_slice %249 {offsets = [2, 0], sizes = [1, 128], strides = [1, 1]} : vector<8x128xf32> to vector<1x128xf32>
    %255 = arith.maximumf %253, %254 : vector<1x128xf32>
    %256 = vector.extract_strided_slice %249 {offsets = [3, 0], sizes = [1, 128], strides = [1, 1]} : vector<8x128xf32> to vector<1x128xf32>
    %257 = arith.maximumf %255, %256 : vector<1x128xf32>
    %258 = vector.extract_strided_slice %249 {offsets = [3, 0], sizes = [1, 128], strides = [1, 1]} : vector<8x128xf32> to vector<1x128xf32>
    %259 = vector.extract_strided_slice %249 {offsets = [4, 0], sizes = [1, 128], strides = [1, 1]} : vector<8x128xf32> to vector<1x128xf32>
    %260 = arith.maximumf %258, %259 : vector<1x128xf32>
    %261 = vector.extract_strided_slice %249 {offsets = [5, 0], sizes = [1, 128], strides = [1, 1]} : vector<8x128xf32> to vector<1x128xf32>
    %262 = arith.maximumf %260, %261 : vector<1x128xf32>
    %263 = vector.extract_strided_slice %249 {offsets = [5, 0], sizes = [1, 128], strides = [1, 1]} : vector<8x128xf32> to vector<1x128xf32>
    %264 = vector.extract_strided_slice %249 {offsets = [6, 0], sizes = [1, 128], strides = [1, 1]} : vector<8x128xf32> to vector<1x128xf32>
    %265 = arith.maximumf %263, %264 : vector<1x128xf32>
    %266 = vector.extract_strided_slice %249 {offsets = [7, 0], sizes = [1, 128], strides = [1, 1]} : vector<8x128xf32> to vector<1x128xf32>
    %267 = arith.maximumf %265, %266 : vector<1x128xf32>
    %268 = tpu.concatenate %252, %257, %262, %267 in 0 : vector<1x128xf32>, vector<1x128xf32>, vector<1x128xf32>, vector<1x128xf32> -> vector<4x128xf32>
    %269 = vector.extract_strided_slice %268 {offsets = [0, 0], sizes = [4, 32], strides = [1, 1]} : vector<4x128xf32> to vector<4x32xf32>
    %c1_38 = arith.constant 1 : index
    %c2_39 = arith.constant 2 : index
    %c0_40 = arith.constant 0 : index
    %c0_41 = arith.constant 0 : index
    %270 = vector.load %arg5[%c1_38, %c2_39, %c0_40, %c0_41] : memref<2x4x4x32xf32, #tpu.memory_space<vmem>>, vector<1x1x4x32xf32>
    %271 = vector.shape_cast %270 : vector<1x1x4x32xf32> to vector<4x32xf32>
    %272 = vector.shape_cast %269 : vector<4x32xf32> to vector<1x1x4x32xf32>
    tpu.vector_store %arg5[%c1_38, %c2_39, %c0_40, %c0_41], %272 {strides = array<i32>} : memref<2x4x4x32xf32, #tpu.memory_space<vmem>>, vector<1x1x4x32xf32>,
    %273 = vector.extract_strided_slice %80 {offsets = [104, 0], sizes = [8, 128], strides = [1, 1]} : vector<128x128xf32> to vector<8x128xf32>
    %274 = vector.extract_strided_slice %80 {offsets = [112, 0], sizes = [8, 128], strides = [1, 1]} : vector<128x128xf32> to vector<8x128xf32>
    %275 = arith.maximumf %273, %274 : vector<8x128xf32>
    %276 = vector.extract_strided_slice %80 {offsets = [120, 0], sizes = [8, 128], strides = [1, 1]} : vector<128x128xf32> to vector<8x128xf32>
    %277 = arith.maximumf %275, %276 : vector<8x128xf32>
    %278 = vector.extract_strided_slice %277 {offsets = [0, 0], sizes = [1, 128], strides = [1, 1]} : vector<8x128xf32> to vector<1x128xf32>
    %279 = vector.extract_strided_slice %277 {offsets = [1, 0], sizes = [1, 128], strides = [1, 1]} : vector<8x128xf32> to vector<1x128xf32>
    %280 = arith.maximumf %278, %279 : vector<1x128xf32>
    %281 = vector.extract_strided_slice %277 {offsets = [1, 0], sizes = [1, 128], strides = [1, 1]} : vector<8x128xf32> to vector<1x128xf32>
    %282 = vector.extract_strided_slice %277 {offsets = [2, 0], sizes = [1, 128], strides = [1, 1]} : vector<8x128xf32> to vector<1x128xf32>
    %283 = arith.maximumf %281, %282 : vector<1x128xf32>
    %284 = vector.extract_strided_slice %277 {offsets = [3, 0], sizes = [1, 128], strides = [1, 1]} : vector<8x128xf32> to vector<1x128xf32>
    %285 = arith.maximumf %283, %284 : vector<1x128xf32>
    %286 = vector.extract_strided_slice %277 {offsets = [3, 0], sizes = [1, 128], strides = [1, 1]} : vector<8x128xf32> to vector<1x128xf32>
    %287 = vector.extract_strided_slice %277 {offsets = [4, 0], sizes = [1, 128], strides = [1, 1]} : vector<8x128xf32> to vector<1x128xf32>
    %288 = arith.maximumf %286, %287 : vector<1x128xf32>
    %289 = vector.extract_strided_slice %277 {offsets = [5, 0], sizes = [1, 128], strides = [1, 1]} : vector<8x128xf32> to vector<1x128xf32>
    %290 = arith.maximumf %288, %289 : vector<1x128xf32>
    %291 = vector.extract_strided_slice %277 {offsets = [5, 0], sizes = [1, 128], strides = [1, 1]} : vector<8x128xf32> to vector<1x128xf32>
    %292 = vector.extract_strided_slice %277 {offsets = [6, 0], sizes = [1, 128], strides = [1, 1]} : vector<8x128xf32> to vector<1x128xf32>
    %293 = arith.maximumf %291, %292 : vector<1x128xf32>
    %294 = vector.extract_strided_slice %277 {offsets = [7, 0], sizes = [1, 128], strides = [1, 1]} : vector<8x128xf32> to vector<1x128xf32>
    %295 = arith.maximumf %293, %294 : vector<1x128xf32>
    %296 = tpu.concatenate %280, %285, %290, %295 in 0 : vector<1x128xf32>, vector<1x128xf32>, vector<1x128xf32>, vector<1x128xf32> -> vector<4x128xf32>
    %297 = vector.extract_strided_slice %296 {offsets = [0, 0], sizes = [4, 32], strides = [1, 1]} : vector<4x128xf32> to vector<4x32xf32>
    %c1_42 = arith.constant 1 : index
    %c3_43 = arith.constant 3 : index
    %c0_44 = arith.constant 0 : index
    %c0_45 = arith.constant 0 : index
    %298 = vector.load %arg5[%c1_42, %c3_43, %c0_44, %c0_45] : memref<2x4x4x32xf32, #tpu.memory_space<vmem>>, vector<1x1x4x32xf32>
    %299 = vector.shape_cast %298 : vector<1x1x4x32xf32> to vector<4x32xf32>
    %300 = vector.shape_cast %297 : vector<4x32xf32> to vector<1x1x4x32xf32>
    tpu.vector_store %arg5[%c1_42, %c3_43, %c0_44, %c0_45], %300 {strides = array<i32>} : memref<2x4x4x32xf32, #tpu.memory_space<vmem>>, vector<1x1x4x32xf32>,
    return
  }
}

</mosaic_0001>

<bundles_post_ra>
// kernel: image_to_token_forward.1
= control target key start
LH: loop header
LB: loop body
LE: loop exit
PB: predicated region body
PF: predicated region fallthrough
CT: control target
= control target key end

     0   :  { %s1746_s17 = smov 4   ;;  %vm327_vm0 = vcmask 1046528   ;;  %s2753_s0 = inlined_call_operand.vmem [shape: bf16[4,2,9,9,4], index: 0, kind: input, shape index: {}]   ;;  %s2754_s1 = inlined_call_operand.vmem [shape: bf16[36,128], index: 1, kind: input, shape index: {}]   ;;  %s2755_s2 = inlined_call_operand.vmem [shape: f32[1,128], index: 2, kind: input, shape index: {}]   ;;  %s2756_s3 = inlined_call_operand.vmem [shape: f32[1,128], index: 3, kind: input, shape index: {}]   ;;  %s2757_s4 = inlined_call_operand.vmem [shape: f32[1,128], index: 4, kind: input, shape index: {}]   ;;  %s2758_s5 = inlined_call_operand.hbm [shape: f32[2,4,4,32], index: 5, kind: output, shape index: {}]  }
   0x1   :  { %v67_v0 = vld [vmem:[%s2753_s0 + $0xd8] sm:$0xf]  ;;  %v1792_v1 = vld [vmem:[%s2753_s0 + $0xe0] sm:$0xf]  ;;  %v1798_v4 = vld [vmem:[%s2753_s0 + $0xb0] sm:$0xf] }
   0x2   :  { %v169_v2 = vunpack.c.l.bf16 %v67_v0  ;;  %v170_v3 = vunpack.c.l.bf16 %v1792_v1  ;;  %v1803_v5 = vld [vmem:[%s2753_s0 + $0xb8] sm:$0xf]  ;;  %v58_v6 = vld [vmem:[%s2753_s0 + $0x90] sm:$0xf]  ;;  %v164_v7 = vunpack.c.l.bf16 %v1798_v4  ;;  %v1818_v11 = vld [vmem:[%s2753_s0 + $0xe8] sm:$0xf] }
   0x3   :  { %v165_v8 = vunpack.c.l.bf16 %v1803_v5  ;;  %v1813_v9 = vld [vmem:[%s2753_s0 + $0x98] sm:$0xf]  ;;  %v160_v10 = vunpack.c.l.bf16 %v58_v6  ;;  %v1823_v12 = vld [vmem:[%s2753_s0 + $0xf0] sm:$0xf]  ;;  %v1831_v15 = vld [vmem:[%s2753_s0 + $0xc0] sm:$0xf]  ;;  %v171_v19 = vunpack.c.l.bf16 %v1818_v11 }
   0x4   :  { %v1416_v13 = vpack.i.bf16 %v170_v3, %v169_v2  ;;  %v161_v14 = vunpack.c.l.bf16 %v1813_v9  ;;  %v1836_v16 = vld [vmem:[%s2753_s0 + $0xc8] sm:$0xf]  ;;  %v1841_v17 = vld [vmem:[%s2753_s0 + $0xa0] sm:$0xf]  ;;  %v172_v22 = vunpack.c.l.bf16 %v1823_v12  ;;  %v166_v23 = vunpack.c.l.bf16 %v1831_v15  ;;  %v23_v27 = vld [vmem:[%s2753_s0 + $0x4] sm:$0x1] }
   0x5   :  { %v1406_v18 = vpack.i.bf16 %v165_v8, %v164_v7  ;;  %v1851_v20 = vld [vmem:[%s2753_s0 + $0xa8] sm:$0xf]  ;;  %v167_v24 = vunpack.c.l.bf16 %v1836_v16  ;;  %v1862_v25 = vld [vmem:[%s2753_s0] sm:$0xf]  ;;  %v162_v26 = vunpack.c.l.bf16 %v1841_v17  ;;  %v25_v29 = vld [vmem:[%s2753_s0 + $0xc] sm:$0x1]  ;;  %v125_v32 = vunpack.c.l.bf16 %v23_v27 }
   0x6   :  { %1417 = vrot.lane.b32.xlu2 %v1416_v13, %s1746_s17  ;;  %v1396_v21 = vpack.i.bf16 %v161_v14, %v160_v10  ;;  %v24_v28 = vld [vmem:[%s2753_s0 + $0x8] sm:$0xf]  ;;  %v163_v30 = vunpack.c.l.bf16 %v1851_v20  ;;  %v124_v31 = vunpack.c.l.bf16 %v1862_v25  ;;  %v127_v34 = vunpack.c.l.bf16 %v25_v29  ;;  %v1896_v38 = vld [vmem:[%s2753_s0 + $0x110] sm:$0xf]  ;;  %v76_v39 = vld [vmem:[%s2753_s0 + $0x120] sm:$0xf] }
   0x7   :  { %1407 = vrot.lane.b32.xlu1 %v1406_v18, %s1746_s17  ;;  %v1878_v33 = vunpack.c.l.bf16 %v24_v28  ;;  %v1421_v35 = vpack.i.bf16 %v172_v22, %v171_v19  ;;  %v1411_v36 = vpack.i.bf16 %v167_v24, %v166_v23  ;;  %v1891_v37 = vld [vmem:[%s2753_s0 + $0x108] sm:$0xf]  ;;  %v329_v41 = vrot.slane %v125_v32, 1  ;;  %v77_v46 = vld [vmem:[%s2753_s0 + $0x124] sm:$0x1] }
   0x8   :  { %1397 = vrot.lane.b32.xlu0 %v1396_v21, %s1746_s17  ;;  %v328_v40 = vrot.slane %v124_v31, 1  ;;  %v332_v43 = vrot.slane %v127_v34, 1  ;;  %v78_v44 = vld [vmem:[%s2753_s0 + $0x128] sm:$0xf]  ;;  %v1401_v45 = vpack.i.bf16 %v163_v30, %v162_v26  ;;  %v79_v47 = vld [vmem:[%s2753_s0 + $0x12c] sm:$0x1]  ;;  %v175_v50 = vunpack.c.l.bf16 %v1891_v37 }
   0x9   :  { %v331_v42 = vrot.slane %v1878_v33, 1  ;;  %v1920_v48 = vld [vmem:[%s2753_s0 + $0xf8] sm:$0xf]  ;;  %v1925_v49 = vld [vmem:[%s2753_s0 + $0x100] sm:$0xf]  ;;  %v176_v51 = vunpack.c.l.bf16 %v1896_v38  ;;  %v178_v52 = vunpack.c.l.bf16 %v76_v39  ;;  %v180_v53 = vunpack.c.l.bf16 %v78_v44 }
   0xa   :  { %v330_v54 = vsel %vm327_vm0, %v328_v40, %v329_v41  ;;  %v179_v56 = vunpack.c.l.bf16 %v77_v46  ;;  %v181_v57 = vunpack.c.l.bf16 %v79_v47  ;;  %v173_v58 = vunpack.c.l.bf16 %v1920_v48  ;;  %v26_v62 = vld [vmem:[%s2753_s0 + $0x10] sm:$0xf]  ;;  %v27_v10 = vld [vmem:[%s2753_s0 + $0x14] sm:$0x1]  ;;  %v109_v21 = vld [vmem:[%s2753_s0 + $0x1b8] sm:$0xf] }
   0xb   :  { %v1933_v55 = vsel %vm327_vm0, %v331_v42, %v332_v43  ;;  %v174_v59 = vunpack.c.l.bf16 %v1925_v49  ;;  %v1431_v60 = vpack.i.bf16 %v176_v51, %v175_v50  ;;  %v571_v63 = vrot.slane %v180_v53, 1  ;;  %v108_v18 = vld [vmem:[%s2753_s0 + $0x1b0] sm:$0xf] }
   0xc   :  { %v1436_v61 = vpack.i.bf16 %v1933_v55, %v330_v54  ;;  %v568_v0 = vrot.slane %v178_v52, 1  ;;  %v569_v2 = vrot.slane %v179_v56, 1  ;;  %v572_v6 = vrot.slane %v181_v57, 1 }
   0xd   :  { %v1426_v13 = vpack.i.bf16 %v174_v59, %v173_v58 }
   0xe   :  { %1422 = vrot.lane.b32.xlu2 %v1421_v35, %s1746_s17 }
   0xf   :  { %1412 = vrot.lane.b32.xlu1 %v1411_v36, %s1746_s17 }
  0x10   :  { %1402 = vrot.lane.b32.xlu0 %v1401_v45, %s1746_s17 }
  0x11   :  { %10 = vsyncpa [#allocation3], 0  ;;  %s1747_s26 = smov 8   ;;  %v1960_v27 = vunpack.c.l.bf16 %v26_v62  ;;  %v129_v28 = vunpack.c.l.bf16 %v27_v10  ;;  %v210_v29 = vunpack.c.l.bf16 %v108_v18  ;;  %v211_v32 = vunpack.c.l.bf16 %v109_v21  ;;  %v1970_v42 = vld [vmem:[%s2753_s0 + $0x48] sm:$0xf]  ;;  %s1748_s12 = smov 20  }
  0x12   :  { %v570_v34 = vsel %vm327_vm0, %v568_v0, %v569_v2  ;;  %v573_v35 = vsel %vm327_vm0, %v571_v63, %v572_v6  ;;  %v1441_v43 = vpack.i.bf16 %v180_v53, %v178_v52  ;;  %v41_v44 = vld [vmem:[%s2753_s0 + $0x4c] sm:$0x1]  ;;  %v42_v45 = vld [vmem:[%s2753_s0 + $0x50] sm:$0xf]  ;;  %v43_v46 = vld [vmem:[%s2753_s0 + $0x54] sm:$0x1]  ;;  %v142_v57 = vunpack.c.l.bf16 %v1970_v42 }
  0x13   :  { %v1451_v36 = vpack.i.bf16 %v573_v35, %v570_v34  ;;  %v334_v39 = vrot.slane %v1960_v27, 1  ;;  %v335_v40 = vrot.slane %v129_v28, 1  ;;  %v1446_v41 = vpack.i.bf16 %v211_v32, %v210_v29  ;;  %v30_v47 = vld [vmem:[%s2753_s0 + $0x20] sm:$0xf]  ;;  %v31_v53 = vld [vmem:[%s2753_s0 + $0x24] sm:$0x1] }
  0x14   :  { %v32_v54 = vld [vmem:[%s2753_s0 + $0x28] sm:$0xf]  ;;  %v33_v56 = vld [vmem:[%s2753_s0 + $0x2c] sm:$0x1]  ;;  %s1749_s20 = smov 16   ;;  %v145_v62 = vunpack.c.l.bf16 %v43_v46  ;;  %s1750_s21 = smov 12   ;;  %v2002_v63 = vunpack.c.l.bf16 %v30_v47  ;;  %v133_v0 = vunpack.c.l.bf16 %v31_v53  ;;  %v1461_v10 = vpack.i.bf16 %v162_v26, %v161_v14 }
  0x15   :  { %v1986_v52 = vsel %vm327_vm0, %v334_v39, %v335_v40  ;;  %v2004_v2 = vunpack.c.l.bf16 %v32_v54  ;;  %v135_v6 = vunpack.c.l.bf16 %v33_v56  ;;  %v352_v18 = vrot.slane %v142_v57, 1  ;;  %v84_v9 = vld [vmem:[%s2753_s0 + $0x140] sm:$0xf]  ;;  %v86_v14 = vld [vmem:[%s2753_s0 + $0x148] sm:$0xf]  ;;  %s1751_s27 = smov 32  }
  0x16   :  { %1437 = vrot.lane.b32.xlu2 %v1436_v61, %s1747_s26  ;;  %v1999_v61 = vunpack.c.l.bf16 %v42_v45  ;;  %v356_v29 = vrot.slane %v145_v62, 1  ;;  %v1456_v32 = vpack.i.bf16 %v1960_v27, %v1878_v33  ;;  %v340_v17 = vrot.slane %v2002_v63, 1  ;;  %s1752_s28 = smov 28   ;;  %s1753_s29 = smov 24   ;;  %v87_v45 = vld [vmem:[%s2753_s0 + $0x14c] sm:$0x1] }
  0x17   :  { %1432 = vrot.lane.b32.xlu1 %v1431_v60, %s1746_s17  ;;  %v143_v60 = vunpack.c.l.bf16 %v41_v44  ;;  %v341_v26 = vrot.slane %v133_v0, 1  ;;  %v344_v34 = vrot.slane %v135_v6, 1  ;;  %v186_v35 = vunpack.c.l.bf16 %v84_v9  ;;  %v85_v44 = vld [vmem:[%s2753_s0 + $0x144] sm:$0x1]  ;;  %v92_v0 = vld [vmem:[%s2753_s0 + $0x168] sm:$0xf] }
  0x18   :  { %1427 = vrot.lane.b32.xlu0 %v1426_v13, %s1746_s17  ;;  %v1466_v13 = vpack.i.bf16 %v1986_v52, %v1933_v55  ;;  %v355_v28 = vrot.slane %v1999_v61, 1  ;;  %v343_v55 = vrot.slane %v2004_v2, 1  ;;  %v187_v47 = vunpack.c.l.bf16 %v85_v44  ;;  %v94_v6 = vld [vmem:[%s2753_s0 + $0x170] sm:$0xf]  ;;  %v93_v1 = vld [vmem:[%s2753_s0 + $0x16c] sm:$0x1] }
  0x19   :  { %v353_v21 = vrot.slane %v143_v60, 1  ;;  %v189_v53 = vunpack.c.l.bf16 %v87_v45  ;;  %v580_v60 = vrot.slane %v186_v35, 1  ;;  %v34_v44 = vld [vmem:[%s2753_s0 + $0x30] sm:$0xf]  ;;  %v36_v4 = vld [vmem:[%s2753_s0 + $0x38] sm:$0xf] }
  0x1a   :  { %v2029_v40 = vsel %vm327_vm0, %v355_v28, %v356_v29  ;;  %v2064_v28 = vpack.i.bf16 %v171_v19, %v170_v3  ;;  %v194_v29 = vunpack.c.l.bf16 %v92_v0  ;;  %v95_v3 = vld [vmem:[%s2753_s0 + $0x174] sm:$0x1]  ;;  %v195_v19 = vunpack.c.l.bf16 %v93_v1  ;;  %v122_v12 = vld [vmem:[%s2753_s0 + $0x228] sm:$0xf] }
  0x1b   :  { %v354_v39 = vsel %vm327_vm0, %v352_v18, %v353_v21  ;;  %v112_v18 = vld [vmem:[%s2753_s0 + $0x1d0] sm:$0xf]  ;;  %v113_v21 = vld [vmem:[%s2753_s0 + $0x1d8] sm:$0xf]  ;;  %vm820_vm1 = vcmask 31744   ;;  %vm1008_vm2 = vcmask 1041408  }
  0x1c   :  { %v1481_v46 = vpack.i.bf16 %v2029_v40, %v354_v39  ;;  %v593_v45 = vrot.slane %v195_v19, 1  ;;  %v45_v19 = vld [vmem:[%s2753_s0 + $0x5c] sm:$0x1]  ;;  %vm837_vm3 = vcmask 64512   ;;  %vm854_vm4 = vcmask 97280  }
  0x1d   :  { %vm871_vm5 = vcmask 130048   ;;  %vm888_vm6 = vcmask 162816   ;;  %vm905_vm7 = vcmask 195584   ;;  %vm922_vm8 = vcmask 228352  }
  0x1e   :  { %1452 = vrot.lane.b32.xlu2 %v1451_v36, %s1748_s12  ;;  %v188_v36 = vunpack.c.l.bf16 %v86_v14  ;;  %vm939_vm9 = vcmask 261120   ;;  %vm983_vm10 = vcmask 293888   ;;  %vm1202_vm14 = vcmask 1040384  }
  0x1f   :  { %1447 = vrot.lane.b32.xlu1 %v1446_v41, %s1749_s20  ;;  %v2033_v41 = vsel %vm327_vm0, %v340_v17, %v341_v26  ;;  %v214_v17 = vunpack.c.l.bf16 %v112_v18  ;;  %v215_v26 = vunpack.c.l.bf16 %v113_v21  ;;  %v28_v21 = vld [vmem:[%s2753_s0 + $0x18] sm:$0xf]  ;;  %vm1205_vm15 = vcmask 1042432  }
  0x20   :  { %1442 = vrot.lane.b32.xlu0 %v1441_v43, %s1750_s21  ;;  %v2036_v43 = vsel %vm327_vm0, %v343_v55, %v344_v34  ;;  %v583_v54 = vrot.slane %v188_v36, 1  ;;  %v1476_v56 = vpack.i.bf16 %v188_v36, %v186_v35  ;;  %v197_v55 = vunpack.c.l.bf16 %v95_v3 }
  0x21   :  { %v1471_v62 = vpack.i.bf16 %v2036_v43, %v2033_v41  ;;  %v592_v36 = vrot.slane %v194_v29, 1  ;;  %v1486_v39 = vpack.i.bf16 %v215_v26, %v214_v17  ;;  %v2107_v26 = vunpack.c.l.bf16 %v28_v21 }
  0x26   :  { %1467 = vrot.lane.b32.xlu2 %v1466_v13, %s1751_s27  ;;  %v584_v13 = vrot.slane %v189_v53, 1  ;;  %v117_v53 = vld [vmem:[%s2753_s0 + $0x200] sm:$0xf] }
  0x27   :  { %1462 = vrot.lane.b32.xlu1 %v1461_v10, %s1752_s28  ;;  %v581_v10 = vrot.slane %v187_v47, 1  ;;  %v116_v47 = vld [vmem:[%s2753_s0 + $0x1f8] sm:$0xf]  ;;  %v219_v0 = vunpack.c.l.bf16 %v117_v53 }
  0x28   :  { %1457 = vrot.lane.b32.xlu0 %v1456_v32, %s1753_s29  ;;  %v196_v32 = vunpack.c.l.bf16 %v94_v6  ;;  %v585_v14 = vsel %vm327_vm0, %v583_v54, %v584_v13  ;;  %v2087_v54 = vunpack.c.l.bf16 %v34_v44  ;;  %v35_v6 = vld [vmem:[%s2753_s0 + $0x34] sm:$0x1]  ;;  %v48_v44 = vld [vmem:[%s2753_s0 + $0x68] sm:$0xf] }
  0x29   :  { %v582_v9 = vsel %vm327_vm0, %v580_v60, %v581_v10  ;;  %v137_v13 = vunpack.c.l.bf16 %v35_v6 }
  0x2a   :  { %v1496_v11 = vpack.i.bf16 %v585_v14, %v582_v9  ;;  %v595_v34 = vrot.slane %v196_v32, 1  ;;  %v1491_v35 = vpack.i.bf16 %v196_v32, %v194_v29  ;;  %v1506_v18 = vpack.i.bf16 %v2087_v54, %v2004_v2  ;;  %v29_v29 = vld [vmem:[%s2753_s0 + $0x1c] sm:$0x1]  ;;  %v44_v9 = vld [vmem:[%s2753_s0 + $0x58] sm:$0xf] }
  0x2b   :  { %v346_v14 = vrot.slane %v2087_v54, 1  ;;  %v347_v17 = vrot.slane %v137_v13, 1  ;;  %v131_v1 = vunpack.c.l.bf16 %v29_v29  ;;  %v2111_v3 = vunpack.c.l.bf16 %v44_v9  ;;  %v81_v29 = vld [vmem:[%s2753_s0 + $0x134] sm:$0x1]  ;;  %v80_v9 = vld [vmem:[%s2753_s0 + $0x130] sm:$0xf] }
  0x2d   :  { %v358_v53 = vrot.slane %v2111_v3, 1 }
  0x2e   :  { %1482 = vrot.lane.b32.xlu2 %v1481_v46, %s1747_s26  ;;  %v596_v46 = vrot.slane %v197_v55, 1  ;;  %v337_v55 = vrot.slane %v2107_v26, 1 }
  0x2f   :  { %1477 = vrot.lane.b32.xlu1 %v1476_v56, %s1750_s21  ;;  %v594_v56 = vsel %vm327_vm0, %v592_v36, %v593_v45  ;;  %v147_v36 = vunpack.c.l.bf16 %v45_v19  ;;  %v49_v45 = vld [vmem:[%s2753_s0 + $0x6c] sm:$0x1] }
  0x30   :  { %1472 = vrot.lane.b32.xlu0 %v1471_v62, %s1747_s26  ;;  %v597_v60 = vsel %vm327_vm0, %v595_v34, %v596_v46  ;;  %v218_v62 = vunpack.c.l.bf16 %v116_v47  ;;  %v338_v34 = vrot.slane %v131_v1, 1  ;;  %v1516_v46 = vpack.i.bf16 %v166_v23, %v165_v8  ;;  %v51_v47 = vld [vmem:[%s2753_s0 + $0x74] sm:$0x1] }
  0x31   :  { %v1511_v10 = vpack.i.bf16 %v597_v60, %v594_v56  ;;  %v359_v56 = vrot.slane %v147_v36, 1  ;;  %v151_v5 = vunpack.c.l.bf16 %v49_v45  ;;  %v153_v15 = vunpack.c.l.bf16 %v51_v47 }
  0x32   :  { %v1501_v32 = vpack.i.bf16 %v219_v0, %v218_v62  ;;  %v2143_v60 = vsel %vm327_vm0, %v337_v55, %v338_v34  ;;  %v2145_v62 = vunpack.c.l.bf16 %v48_v44  ;;  %v183_v34 = vunpack.c.l.bf16 %v81_v29 }
  0x33   :  { %v2152_v23 = vsel %vm327_vm0, %v358_v53, %v359_v56  ;;  %v1536_v0 = vpack.i.bf16 %v2143_v60, %v1986_v52  ;;  %v365_v13 = vrot.slane %v151_v5, 1  ;;  %v368_v21 = vrot.slane %v153_v15, 1  ;;  %v110_v52 = vld [vmem:[%s2753_s0 + $0x1c0] sm:$0xf]  ;;  %v100_v56 = vld [vmem:[%s2753_s0 + $0x188] sm:$0xf] }
  0x34   :  { %v1541_v6 = vpack.i.bf16 %v2152_v23, %v2029_v40  ;;  %v111_v40 = vld [vmem:[%s2753_s0 + $0x1c8] sm:$0xf]  ;;  %v182_v36 = vunpack.c.l.bf16 %v80_v9  ;;  %v575_v47 = vrot.slane %v183_v34, 1  ;;  %v102_v15 = vld [vmem:[%s2753_s0 + $0x190] sm:$0xf] }
  0x35   :  { %v213_v1 = vunpack.c.l.bf16 %v111_v40  ;;  %v204_v29 = vunpack.c.l.bf16 %v102_v15  ;;  %v53_v15 = vld [vmem:[%s2753_s0 + $0x7c] sm:$0x1] }
  0x36   :  { %1497 = vrot.lane.b32.xlu2 %v1496_v11, %s1748_s12  ;;  %v2114_v11 = vsel %vm327_vm0, %v346_v14, %v347_v17  ;;  %v82_v14 = vld [vmem:[%s2753_s0 + $0x138] sm:$0xf]  ;;  %v212_v17 = vunpack.c.l.bf16 %v110_v52 }
  0x37   :  { %1492 = vrot.lane.b32.xlu1 %v1491_v35, %s1750_s21  ;;  %v1526_v35 = vpack.i.bf16 %v2114_v11, %v2036_v43  ;;  %v50_v43 = vld [vmem:[%s2753_s0 + $0x70] sm:$0xf]  ;;  %v607_v34 = vrot.slane %v204_v29, 1 }
  0x38   :  { %1487 = vrot.lane.b32.xlu0 %v1486_v39, %s1749_s20  ;;  %v1521_v39 = vpack.i.bf16 %v2111_v3, %v1999_v61  ;;  %v2149_v8 = vunpack.c.l.bf16 %v50_v43  ;;  %v1556_v45 = vpack.i.bf16 %v213_v1, %v212_v17  ;;  %v574_v43 = vrot.slane %v182_v36, 1 }
  0x3e   :  { %1512 = vrot.lane.b32.xlu2 %v1511_v10, %s1748_s12  ;;  %v364_v10 = vrot.slane %v2145_v62, 1 }
  0x3f   :  { %1507 = vrot.lane.b32.xlu1 %v1506_v18, %s1753_s29  ;;  %v367_v18 = vrot.slane %v2149_v8, 1 }
  0x40   :  { %1502 = vrot.lane.b32.xlu0 %v1501_v32, %s1749_s20  ;;  %v83_v32 = vld [vmem:[%s2753_s0 + $0x13c] sm:$0x1]  ;;  %v2182_v19 = vsel %vm327_vm0, %v364_v10, %v365_v13  ;;  %v103_v10 = vld [vmem:[%s2753_s0 + $0x194] sm:$0x1] }
  0x41   :  { %v2185_v55 = vsel %vm327_vm0, %v367_v18, %v368_v21  ;;  %v202_v21 = vunpack.c.l.bf16 %v100_v56  ;;  %v205_v9 = vunpack.c.l.bf16 %v103_v10  ;;  %v46_v56 = vld [vmem:[%s2753_s0 + $0x60] sm:$0xf] }
  0x42   :  { %v1551_v44 = vpack.i.bf16 %v2185_v55, %v2182_v19 }
  0x43   :  { %v1561_v1 = vpack.i.bf16 %v204_v29, %v202_v21 }
  0x46   :  { %1527 = vrot.lane.b32.xlu2 %v1526_v35, %s1751_s27  ;;  %v185_v35 = vunpack.c.l.bf16 %v83_v32  ;;  %v576_v32 = vsel %vm327_vm0, %v574_v43, %v575_v47  ;;  %v1586_v43 = vpack.i.bf16 %v164_v7, %v163_v30  ;;  %v37_v7 = vld [vmem:[%s2753_s0 + $0x3c] sm:$0x1]  ;;  %v2245_v30 = vunpack.c.l.bf16 %v46_v56 }
  0x47   :  { %1522 = vrot.lane.b32.xlu1 %v1521_v39, %s1753_s29  ;;  %v184_v39 = vunpack.c.l.bf16 %v82_v14 }
  0x48   :  { %1517 = vrot.lane.b32.xlu0 %v1516_v46, %s1752_s28  ;;  %v578_v53 = vrot.slane %v185_v35, 1  ;;  %v604_v35 = vrot.slane %v202_v21, 1  ;;  %v1601_v21 = vpack.i.bf16 %v175_v50, %v174_v59  ;;  %v88_v59 = vld [vmem:[%s2753_s0 + $0x150] sm:$0xf]  ;;  %v361_v56 = vrot.slane %v2245_v30, 1 }
  0x49   :  { %v577_v46 = vrot.slane %v184_v39, 1  ;;  %v1546_v5 = vpack.i.bf16 %v184_v39, %v182_v36  ;;  %v608_v39 = vrot.slane %v205_v9, 1 }
  0x4b   :  { %v579_v52 = vsel %vm327_vm0, %v577_v46, %v578_v53  ;;  %v609_v46 = vsel %vm327_vm0, %v607_v34, %v608_v39  ;;  %v1576_v53 = vpack.i.bf16 %v2002_v63, %v2107_v26 }
  0x4c   :  { %v1566_v17 = vpack.i.bf16 %v579_v52, %v576_v32  ;;  %v1596_v52 = vpack.i.bf16 %v2033_v41, %v2143_v60  ;;  %v47_v41 = vld [vmem:[%s2753_s0 + $0x64] sm:$0x1] }
  0x4e   :  { %1542 = vrot.lane.b32.xlu2 %v1541_v6, %s1751_s27  ;;  %v101_v6 = vld [vmem:[%s2753_s0 + $0x18c] sm:$0x1] }
  0x4f   :  { %1537 = vrot.lane.b32.xlu1 %v1536_v0, %s1747_s26  ;;  %v121_v0 = vld [vmem:[%s2753_s0 + $0x220] sm:$0xf]  ;;  %v203_v40 = vunpack.c.l.bf16 %v101_v6 }
  0x50   :  { %1532 = vrot.lane.b32.xlu0 %v2064_v28, %s1752_s28  ;;  %v120_v28 = vld [vmem:[%s2753_s0 + $0x218] sm:$0xf]  ;;  %v223_v18 = vunpack.c.l.bf16 %v121_v0  ;;  %v155_v0 = vunpack.c.l.bf16 %v53_v15 }
  0x51   :  { %v222_v13 = vunpack.c.l.bf16 %v120_v28  ;;  %v605_v36 = vrot.slane %v203_v40, 1 }
  0x52   :  { %v371_v49 = vrot.slane %v155_v0, 1 }
  0x53   :  { %v1571_v14 = vpack.i.bf16 %v223_v18, %v222_v13  ;;  %v2249_v13 = vunpack.c.l.bf16 %v36_v4  ;;  %v139_v18 = vunpack.c.l.bf16 %v37_v7  ;;  %v2312_v7 = vld [vmem:[%s2753_s0 + $0x178] sm:$0xf] }
  0x55   :  { %v349_v37 = vrot.slane %v2249_v13, 1  ;;  %v350_v50 = vrot.slane %v139_v18, 1 }
  0x56   :  { %1557 = vrot.lane.b32.xlu2 %v1556_v45, %s1749_s20  ;;  %v606_v45 = vsel %vm327_vm0, %v604_v35, %v605_v36  ;;  %v149_v35 = vunpack.c.l.bf16 %v47_v41  ;;  %v230_v36 = vld [vmem:[%s2754_s1 + $0x10] sm:$0x3] }
  0x57   :  { %1552 = vrot.lane.b32.xlu1 %v1551_v44, %s1747_s26  ;;  %v1581_v47 = vpack.i.bf16 %v609_v46, %v606_v45  ;;  %v2287_v34 = vsel %vm327_vm0, %v349_v37, %v350_v50  ;;  %v977_v45 = vunpack.c.l.b16 %v230_v36  ;;  %v1376_v37 = vld [vmem:[%s2754_s1 + $0x8] sm:$0xff]  ;;  %v119_v41 = vld [vmem:[%s2753_s0 + $0x210] sm:$0xf] }
  0x58   :  { %1547 = vrot.lane.b32.xlu0 %v1546_v5, %s1750_s21  ;;  %v52_v5 = vld [vmem:[%s2753_s0 + $0x78] sm:$0xf]  ;;  %v362_v4 = vrot.slane %v149_v35, 1 }
  0x59   :  { %v2247_v28 = vunpack.c.l.bf16 %v52_v5  ;;  %v89_v5 = vld [vmem:[%s2753_s0 + $0x154] sm:$0x1]  ;;  %v980_v15 = vpack.c.b16 %v977_v45, %v977_v45 }
  0x5b   :  { %v1591_v40 = vpack.i.bf16 %v2247_v28, %v2149_v8  ;;  %v370_v9 = vrot.slane %v2247_v28, 1 }
  0x5e   :  { %1572 = vrot.lane.b32.xlu2 %v1571_v14, %s1749_s20  ;;  %v2284_v14 = vsel %vm327_vm0, %v370_v9, %v371_v49  ;;  %v2330_v49 = vsel %vm327_vm0, %v361_v56, %v362_v4  ;;  %v221_v56 = vunpack.c.l.bf16 %v119_v41 }
  0x5f   :  { %1567 = vrot.lane.b32.xlu1 %v1566_v17, %s1748_s12  ;;  %v190_v17 = vunpack.c.l.bf16 %v88_v59  ;;  %v1611_v46 = vpack.i.bf16 %v2284_v14, %v2185_v55  ;;  %v91_v55 = vld [vmem:[%s2753_s0 + $0x15c] sm:$0x1]  ;;  %v1676_v25 = vpack.i.bf16 %v2182_v19, %v2330_v49 }
  0x60   :  { %1562 = vrot.lane.b32.xlu0 %v1561_v1, %s1750_s21  ;;  %v2217_v44 = vpop.permute.xlu2 %1417  ;;  %v193_v18 = vunpack.c.l.bf16 %v91_v55 }
  0x61   :  { %v586_v36 = vrot.slane %v190_v17, 1 }
  0x66   :  { %1587 = vrot.lane.b32.xlu2 %v1586_v43, %s1752_s28  ;;  %v114_v43 = vld [vmem:[%s2753_s0 + $0x1e0] sm:$0xf] }
  0x67   :  { %1582 = vrot.lane.b32.xlu1 %v1581_v47, %s1748_s12  ;;  %v115_v47 = vld [vmem:[%s2753_s0 + $0x1e8] sm:$0xf] }
  0x68   :  { %1577 = vrot.lane.b32.xlu0 %v1576_v53, %s1753_s29  ;;  %v1423_v20 = vpop.permute.xlu2 %1422  ;;  %v1606_v53 = vpack.i.bf16 %v2287_v34, %v2114_v11  ;;  %v2317_v11 = vld [vmem:[%s2753_s0 + $0x180] sm:$0xf]  ;;  %v217_v0 = vunpack.c.l.bf16 %v115_v47  ;;  %v97_v47 = vld [vmem:[%s2753_s0 + $0x17c] sm:$0x1] }
  0x69   :  { %v1425_v6 = vunpack.i.h.bf16 %v1423_v20  ;;  %v1424_v10 = vunpack.i.l.bf16 %v1423_v20  ;;  %v216_v20 = vunpack.c.l.bf16 %v114_v43  ;;  %v1621_v43 = vpack.i.bf16 %v2330_v49, %v2152_v23 }
  0x6b   :  { %v2257_v29 = vsel %vm820_vm1, %v2111_v3, %v1424_v10  ;;  %v2261_v32 = vsel %vm820_vm1, %v2245_v30, %v1425_v6  ;;  %v90_v3 = vld [vmem:[%s2753_s0 + $0x158] sm:$0xf]  ;;  %v1010_v6 = vsel %vm1008_vm2, %v980_v15, 0  ;;  %v191_v10 = vunpack.c.l.bf16 %v89_v5  ;;  %v99_v5 = vld [vmem:[%s2753_s0 + $0x184] sm:$0x1] }
  0x6c   :  { %v192_v1 = vunpack.c.l.bf16 %v90_v3  ;;  %1017 = vmatpush.bf16.msra.mxu0 %v1010_v6  ;;  %1377 = vmatpush.bf16.msra.mxu1 %v1010_v6  ;;  %v1626_v59 = vpack.i.bf16 %v217_v0, %v216_v20  ;;  %v118_v3 = vld [vmem:[%s2753_s0 + $0x208] sm:$0xf]  ;;  %v199_v15 = vunpack.c.l.bf16 %v97_v47 }
  0x6d   :  { %1378 = vmatpush.bf16.msra.mxu2 %v1010_v6  ;;  %1379 = vmatpush.bf16.msra.mxu3 %v1010_v6 }
  0x6e   :  { %1602 = vrot.lane.b32.xlu2 %v1601_v21, %s1752_s28  ;;  %v1616_v39 = vpack.i.bf16 %v192_v1, %v190_v17  ;;  %v589_v45 = vrot.slane %v192_v1, 1  ;;  %v38_v17 = vld [vmem:[%s2753_s0 + $0x40] sm:$0xf] }
  0x6f   :  { %1597 = vrot.lane.b32.xlu1 %v1596_v52, %s1751_s27  ;;  %v198_v52 = vunpack.c.l.bf16 %v2312_v7  ;;  %v1375_v1 = vld [vmem:[%s2754_s1] sm:$0xff]  ;;  %v201_v7 = vunpack.c.l.bf16 %v99_v5 }
  0x70   :  { %1592 = vrot.lane.b32.xlu0 %v1591_v40, %s1753_s29  ;;  %v2281_v60 = vpop.permute.xlu2 %1437  ;;  %v200_v40 = vunpack.c.l.bf16 %v2317_v11  ;;  %1018 = vmatpush.bf16.msra.mxu0 %v1376_v37  ;;  %v140_v11 = vunpack.c.l.bf16 %v38_v17 }
  0x71   :  { %1380 = vmatpush.bf16.msra.mxu1 %v1376_v37  ;;  %1381 = vmatpush.bf16.msra.mxu2 %v1376_v37  ;;  %v602_v47 = vrot.slane %v201_v7, 1 }
  0x72   :  { %v1631_v35 = vpack.i.bf16 %v200_v40, %v198_v52  ;;  %1382 = vmatpush.bf16.msra.mxu3 %v1376_v37 }
  0x74   :  { %1019 = vmatpush.bf16.msra.mxu0 %v1375_v1 }
  0x75   :  { %1383 = vmatpush.bf16.msra.mxu1 %v1375_v1  ;;  %1384 = vmatpush.bf16.msra.mxu2 %v1375_v1 }
  0x76   :  { %1617 = vrot.lane.b32.xlu2 %v1616_v39, %s1750_s21  ;;  %v587_v39 = vrot.slane %v191_v10, 1  ;;  %1385 = vmatpush.bf16.msra.mxu3 %v1375_v1 }
  0x77   :  { %1612 = vrot.lane.b32.xlu1 %v1611_v46, %s1751_s27  ;;  %v590_v46 = vrot.slane %v193_v18, 1 }
  0x78   :  { %1607 = vrot.lane.b32.xlu0 %v1606_v53, %s1747_s26  ;;  %v2323_v21 = vpop.permute.xlu2 %1452  ;;  %v220_v53 = vunpack.c.l.bf16 %v118_v3  ;;  %v588_v23 = vsel %vm327_vm0, %v586_v36, %v587_v39  ;;  %v599_v36 = vrot.slane %v199_v15, 1 }
  0x79   :  { %v2327_v9 = vpop.permute.xlu1 %1407  ;;  %v591_v55 = vsel %vm327_vm0, %v589_v45, %v590_v46  ;;  %v66_v46 = vld [vmem:[%s2753_s0 + $0xd0] sm:$0xf] }
  0x7a   :  { %v2335_v50 = vpop.permute.xlu0 %1397  ;;  %v1641_v0 = vpack.i.bf16 %v221_v56, %v220_v53  ;;  %v1636_v37 = vpack.i.bf16 %v591_v55, %v588_v23  ;;  %v55_v23 = vld [vmem:[%s2753_s0 + $0x84] sm:$0x1]  ;;  %v1410_v38 = vunpack.i.h.bf16 %v2327_v9 }
  0x7e   :  { %1632 = vrot.lane.b32.xlu2 %v1631_v35, %s1750_s21  ;;  %v598_v35 = vrot.slane %v198_v52, 1 }
  0x7f   :  { %1627 = vrot.lane.b32.xlu1 %v1626_v59, %s1749_s20  ;;  %v1646_v59 = vpack.i.bf16 %v140_v11, %v2249_v13 }
  0x80   :  { %1622 = vrot.lane.b32.xlu0 %v1621_v43, %s1747_s26  ;;  %v2362_v4 = vpop.permute.xlu2 %1467  ;;  %v601_v43 = vrot.slane %v200_v40, 1  ;;  %v168_v40 = vunpack.c.l.bf16 %v66_v46 }
  0x81   :  { %v1413_v20 = vpop.permute.xlu1 %1412 }
  0x82   :  { %v1415_v6 = vunpack.i.h.bf16 %v1413_v20  ;;  %v1414_v10 = vunpack.i.l.bf16 %v1413_v20  ;;  %v1403_v18 = vpop.permute.xlu0 %1402  ;;  %v603_v5 = vsel %vm327_vm0, %v601_v43, %v602_v47  ;;  %v1661_v20 = vpack.i.bf16 %v2145_v62, %v2245_v30 }
  0x83   :  { %v1405_v3 = vunpack.i.h.bf16 %v1403_v18  ;;  %v1404_v41 = vunpack.i.l.bf16 %v1403_v18  ;;  %v1440_v43 = vunpack.i.h.bf16 %v2281_v60 }
  0x84   :  { %v2367_v39 = vsel %vm820_vm1, %v2087_v54, %v1414_v10  ;;  %v2371_v45 = vsel %vm820_vm1, %v2249_v13, %v1415_v6  ;;  %v54_v54 = vld [vmem:[%s2753_s0 + $0x80] sm:$0xf]  ;;  %v39_v13 = vld [vmem:[%s2753_s0 + $0x44] sm:$0x1]  ;;  %v1656_v10 = vpack.i.bf16 %v168_v40, %v167_v24 }
  0x85   :  { %v2378_v53 = vsel %vm820_vm1, %v1960_v27, %v1404_v41  ;;  %v2382_v52 = vsel %vm820_vm1, %v2107_v26, %v1405_v3  ;;  %v2393_v27 = vunpack.c.l.bf16 %v54_v54  ;;  %v600_v26 = vsel %vm327_vm0, %v598_v35, %v599_v36  ;;  %v104_v54 = vld [vmem:[%s2753_s0 + $0x198] sm:$0xf] }
  0x86   :  { %1647 = vrot.lane.b32.xlu2 %v1646_v59, %s1753_s29  ;;  %v141_v1 = vunpack.c.l.bf16 %v39_v13  ;;  %v1651_v18 = vpack.i.bf16 %v603_v5, %v600_v26  ;;  %v766_v3 = vrot.slane %v140_v11, 1  ;;  %v157_v41 = vunpack.c.l.bf16 %v55_v23 }
  0x87   :  { %1642 = vrot.lane.b32.xlu1 %v1641_v0, %s1749_s20  ;;  %v1399_v35 = vunpack.i.l.bf16 %v2335_v50  ;;  %v1439_v11 = vunpack.i.l.bf16 %v2281_v60  ;;  %v373_v36 = vrot.slane %v2393_v27, 1  ;;  %v106_v60 = vld [vmem:[%s2753_s0 + $0x1a0] sm:$0xf]  ;;  %v1671_v5 = vpack.i.bf16 %v173_v58, %v172_v22  ;;  %v123_v22 = vld [vmem:[%s2753_s0 + $0x230] sm:$0xf] }
  0x88   :  { %1637 = vrot.lane.b32.xlu0 %v1636_v37, %s1748_s12  ;;  %v2395_v56 = vpop.permute.xlu2 %1482  ;;  %v767_v24 = vrot.slane %v141_v1, 1  ;;  %v374_v46 = vrot.slane %v157_v41, 1  ;;  %v206_v23 = vunpack.c.l.bf16 %v104_v54  ;;  %v208_v49 = vunpack.c.l.bf16 %v106_v60 }
  0x89   :  { %v1433_v17 = vpop.permute.xlu1 %1432 }
  0x8a   :  { %v1435_v55 = vunpack.i.h.bf16 %v1433_v17  ;;  %v1434_v15 = vunpack.i.l.bf16 %v1433_v17  ;;  %v1428_v7 = vpop.permute.xlu0 %1427  ;;  %v768_v47 = vsel %vm327_vm0, %v766_v3, %v767_v24  ;;  %v2453_v1 = vsel %vm327_vm0, %v373_v36, %v374_v46 }
  0x8b   :  { %v1430_v0 = vunpack.i.h.bf16 %v1428_v7  ;;  %v1429_v6 = vunpack.i.l.bf16 %v1428_v7  ;;  %v107_v7 = vld [vmem:[%s2753_s0 + $0x1a4] sm:$0x1]  ;;  %v613_v60 = vrot.slane %v208_v49, 1 }
  0x8c   :  { %v2408_v37 = vsel %vm820_vm1, %v2247_v28, %v1434_v15  ;;  %v2412_v59 = vsel %vm820_vm1, %v2393_v27, %v1435_v55  ;;  %v1400_v28 = vunpack.i.h.bf16 %v2335_v50 }
  0x8d   :  { %v2417_v30 = vsel %vm820_vm1, %v2145_v62, %v1429_v6  ;;  %v2421_v16 = vsel %vm820_vm1, %v2149_v8, %v1430_v0  ;;  %v821_v8 = vsel %vm820_vm1, %v124_v31, %v1399_v35  ;;  %v225_v0 = vunpack.c.l.bf16 %v123_v22 }
  0x8e   :  { %1662 = vrot.lane.b32.xlu2 %v1661_v20, %s1753_s29  ;;  %v822_v13 = vsel %vm820_vm1, %v1878_v33, %v1400_v28  ;;  %v838_v17 = vsel %vm837_vm3, %v821_v8, %v1439_v11  ;;  %v1666_v33 = vpack.i.bf16 %v768_v47, %v2287_v34  ;;  %v105_v34 = vld [vmem:[%s2753_s0 + $0x19c] sm:$0x1]  ;;  %v224_v20 = vunpack.c.l.bf16 %v122_v12 }
  0x8f   :  { %1657 = vrot.lane.b32.xlu1 %v1656_v10, %s1752_s28  ;;  %v839_v19 = vsel %vm837_vm3, %v822_v13, %v1440_v43  ;;  %v1455_v6 = vunpack.i.h.bf16 %v2323_v21  ;;  %v1454_v10 = vunpack.i.l.bf16 %v2323_v21  ;;  %v207_v28 = vunpack.c.l.bf16 %v105_v34 }
  0x90   :  { %1652 = vrot.lane.b32.xlu0 %v1651_v18, %s1748_s12  ;;  %v2429_v62 = vpop.permute.xlu2 %1497  ;;  %v1681_v18 = vpack.i.bf16 %v2453_v1, %v2284_v14  ;;  %v209_v21 = vunpack.c.l.bf16 %v107_v7  ;;  %v1686_v43 = vpack.i.bf16 %v208_v49, %v206_v23  ;;  %v1691_v8 = vpack.i.bf16 %v225_v0, %v224_v20 }
  0x91   :  { %v1448_v50 = vpop.permute.xlu1 %1447  ;;  %v1469_v14 = vunpack.i.l.bf16 %v2362_v4 }
  0x92   :  { %v1443_v40 = vpop.permute.xlu0 %1442  ;;  %v1450_v55 = vunpack.i.h.bf16 %v1448_v50  ;;  %v1449_v15 = vunpack.i.l.bf16 %v1448_v50  ;;  %v1470_v50 = vunpack.i.h.bf16 %v2362_v4  ;;  %v75_v4 = vld [vmem:[%s2753_s0 + $0x118] sm:$0xf] }
  0x93   :  { %v1445_v31 = vunpack.i.h.bf16 %v1443_v40  ;;  %v1444_v26 = vunpack.i.l.bf16 %v1443_v40 }
  0x95   :  { %v855_v48 = vsel %vm854_vm4, %v838_v17, %v1444_v26  ;;  %v856_v58 = vsel %vm854_vm4, %v839_v19, %v1445_v31  ;;  %v56_v31 = vld [vmem:[%s2753_s0 + $0x88] sm:$0xf]  ;;  %v611_v17 = vrot.slane %v207_v28, 1  ;;  %v177_v19 = vunpack.c.l.bf16 %v75_v4 }
  0x96   :  { %1677 = vrot.lane.b32.xlu2 %v1676_v25, %s1751_s27  ;;  %v872_v41 = vsel %vm871_vm5, %v855_v48, %v1449_v15  ;;  %v873_v35 = vsel %vm871_vm5, %v856_v58, %v1450_v55  ;;  %v610_v25 = vrot.slane %v206_v23, 1  ;;  %v57_v23 = vld [vmem:[%s2753_s0 + $0x8c] sm:$0x1]  ;;  %v158_v22 = vunpack.c.l.bf16 %v56_v31 }
  0x97   :  { %1672 = vrot.lane.b32.xlu1 %v1671_v5, %s1752_s28  ;;  %v889_v13 = vsel %vm888_vm6, %v872_v41, %v1454_v10  ;;  %v890_v40 = vsel %vm888_vm6, %v873_v35, %v1455_v6  ;;  %v159_v20 = vunpack.c.l.bf16 %v57_v23  ;;  %v1706_v10 = vpack.i.bf16 %v177_v19, %v176_v51 }
  0x98   :  { %1667 = vrot.lane.b32.xlu0 %v1666_v33, %s1751_s27  ;;  %v2477_v3 = vpop.permute.xlu2 %1512  ;;  %v614_v33 = vrot.slane %v209_v21, 1  ;;  %v612_v34 = vsel %vm327_vm0, %v610_v25, %v611_v17  ;;  %v1701_v41 = vpack.i.bf16 %v158_v22, %v2393_v27  ;;  %v1409_v51 = vunpack.i.l.bf16 %v2327_v9 }
  0x99   :  { %v1463_v24 = vpop.permute.xlu1 %1462  ;;  %v1420_v25 = vunpack.i.h.bf16 %v2217_v44  ;;  %v1485_v19 = vunpack.i.h.bf16 %v2395_v56 }
  0x9a   :  { %v1465_v11 = vunpack.i.h.bf16 %v1463_v24  ;;  %v1464_v36 = vunpack.i.l.bf16 %v1463_v24  ;;  %v1458_v46 = vpop.permute.xlu0 %1457  ;;  %v615_v7 = vsel %vm327_vm0, %v613_v60, %v614_v33  ;;  %v769_v24 = vrot.slane %v158_v22, 1 }
  0x9b   :  { %v1460_v47 = vunpack.i.h.bf16 %v1458_v46  ;;  %v1459_v54 = vunpack.i.l.bf16 %v1458_v46  ;;  %v1696_v35 = vpack.i.bf16 %v615_v7, %v612_v34  ;;  %v830_v23 = vsel %vm820_vm1, %v1999_v61, %v1420_v25 }
  0x9d   :  { %v906_v26 = vsel %vm905_vm7, %v889_v13, %v1459_v54  ;;  %v907_v5 = vsel %vm905_vm7, %v890_v40, %v1460_v47  ;;  %v826_v47 = vsel %vm820_vm1, %v2004_v2, %v1410_v38  ;;  %v1499_v2 = vunpack.i.l.bf16 %v2429_v62 }
  0x9e   :  { %v923_v55 = vsel %vm922_vm8, %v906_v26, %v1464_v36  ;;  %v924_v15 = vsel %vm922_vm8, %v907_v5, %v1465_v11  ;;  %1692 = vrot.lane.b32.xlu2 %v1691_v8, %s1749_s20 }
  0x9f   :  { %1687 = vrot.lane.b32.xlu1 %v1686_v43, %s1750_s21  ;;  %v940_v49 = vsel %vm939_vm9, %v923_v55, %v1469_v14  ;;  %v941_v12 = vsel %vm939_vm9, %v924_v15, %v1470_v50  ;;  %v825_v14 = vsel %vm820_vm1, %v2002_v63, %v1409_v51  ;;  %v1500_v63 = vunpack.i.h.bf16 %v2429_v62 }
  0xa0   :  { %1682 = vrot.lane.b32.xlu0 %v1681_v18, %s1747_s26  ;;  %v956_v48 = vpack.c.bf16 %v941_v12, %v940_v49  ;;  %v2506_v6 = vpop.permute.xlu2 %1527  ;;  %v770_v18 = vrot.slane %v159_v20, 1  ;;  %v1419_v15 = vunpack.i.l.bf16 %v2217_v44  ;;  %v1484_v49 = vunpack.i.l.bf16 %v2395_v56 }
  0xa1   :  { %v1478_v58 = vpop.permute.xlu1 %1477  ;;  %v1530_v62 = vunpack.i.h.bf16 %v2506_v6  ;;  %v1529_v34 = vunpack.i.l.bf16 %v2506_v6 }
  0xa2   :  { %v1473_v0 = vpop.permute.xlu0 %1472  ;;  %1367 = vmatmul.msk.bf16.vlgmr.msra.gmra.mxu0 %vm983_vm10, %v956_v48  ;;  %v771_v21 = vsel %vm327_vm0, %v769_v24, %v770_v18  ;;  %v1480_v54 = vunpack.i.h.bf16 %v1478_v58  ;;  %v847_v24 = vsel %vm837_vm3, %v830_v23, %v1485_v19  ;;  %vm1207_vm0 = vcmask 257024  }
  0xa3   :  { %v1711_v36 = vpack.i.bf16 %v771_v21, %v2453_v1  ;;  %v1475_v27 = vunpack.i.h.bf16 %v1473_v0  ;;  %v1474_v43 = vunpack.i.l.bf16 %v1473_v0  ;;  %v1479_v1 = vunpack.i.l.bf16 %v1478_v58 }
  0xa4   :  { %v1515_v21 = vunpack.i.h.bf16 %v2477_v3 }
  0xa5   :  { %v843_v13 = vsel %vm837_vm3, %v826_v47, %v1475_v27  ;;  %v842_v40 = vsel %vm837_vm3, %v825_v14, %v1474_v43 }
  0xa6   :  { %1707 = vrot.lane.b32.xlu2 %v1706_v10, %s1752_s28  ;;  %v859_v26 = vsel %vm854_vm4, %v842_v40, %v1479_v1  ;;  %v860_v5 = vsel %vm854_vm4, %v843_v13, %v1480_v54 }
  0xa7   :  { %1702 = vrot.lane.b32.xlu1 %v1701_v41, %s1753_s29  ;;  %s1347_s29 = sshll.u32 %s2758_s5, 4  ;;  %s1755_s5 = smov 64   ;;  %s1348_s29 = int_to_ptr.hbm [resolvable:$true] %s1347_s29 }
  0xa8   :  { %1697 = vrot.lane.b32.xlu0 %v1696_v35, %s1748_s12  ;;  %v2516_v46 = vpop.permute.xlu2 %1542  ;;  %v829_v35 = vsel %vm820_vm1, %v142_v57, %v1419_v15  ;;  %v1514_v57 = vunpack.i.l.bf16 %v2477_v3 }
  0xa9   :  { %v1493_v28 = vpop.permute.xlu1 %1492  ;;  %v1545_v1 = vunpack.i.h.bf16 %v2516_v46  ;;  %v1544_v13 = vunpack.i.l.bf16 %v2516_v46 }
  0xaa   :  { %v1488_v11 = vpop.permute.xlu0 %1487  ;;  %v1495_v22 = vunpack.i.h.bf16 %v1493_v28  ;;  %v1494_v48 = vunpack.i.l.bf16 %v1493_v28  ;;  %v846_v28 = vsel %vm837_vm3, %v829_v35, %v1484_v49 }
  0xab   :  { %v1490_v60 = vunpack.i.h.bf16 %v1488_v11  ;;  %v1489_v9 = vunpack.i.l.bf16 %v1488_v11 }
  0xac   :  { %v863_v38 = vsel %vm854_vm4, %v846_v28, %v1494_v48  ;;  %v864_v42 = vsel %vm854_vm4, %v847_v24, %v1495_v22 }
  0xad   :  { %v876_v17 = vsel %vm871_vm5, %v859_v26, %v1489_v9  ;;  %v877_v33 = vsel %vm871_vm5, %v860_v5, %v1490_v60 }
  0xae   :  { %v894_v7 = vsel %vm888_vm6, %v877_v33, %v1500_v63  ;;  %v893_v20 = vsel %vm888_vm6, %v876_v17, %v1499_v2 }
  0xb0   :  { %1712 = vrot.lane.b32.xlu0 %v1711_v36, %s1751_s27  ;;  %v2528_v31 = vpop.permute.xlu2 %1557 }
  0xb1   :  { %v1508_v8 = vpop.permute.xlu1 %1507 }
  0xb2   :  { %v1503_v50 = vpop.permute.xlu0 %1502  ;;  %v1510_v4 = vunpack.i.h.bf16 %v1508_v8  ;;  %v1509_v55 = vunpack.i.l.bf16 %v1508_v8 }
  0xb3   :  { %v1505_v41 = vunpack.i.h.bf16 %v1503_v50  ;;  %v1504_v56 = vunpack.i.l.bf16 %v1503_v50 }
  0xb4   :  { %v910_v61 = vsel %vm905_vm7, %v893_v20, %v1509_v55  ;;  %v911_v10 = vsel %vm905_vm7, %v894_v7, %v1510_v4  ;;  %v1560_v7 = vunpack.i.h.bf16 %v2528_v31  ;;  %v1559_v20 = vunpack.i.l.bf16 %v2528_v31 }
  0xb5   :  { %v880_v27 = vsel %vm871_vm5, %v863_v38, %v1504_v56  ;;  %v881_v43 = vsel %vm871_vm5, %v864_v42, %v1505_v41 }
  0xb6   :  { %v897_v40 = vsel %vm888_vm6, %v880_v27, %v1514_v57  ;;  %v898_v3 = vsel %vm888_vm6, %v881_v43, %v1515_v21 }
  0xb8   :  { %v2562_v14 = vpop.permute.xlu2 %1572 }
  0xb9   :  { %v1523_v12 = vpop.permute.xlu1 %1522  ;;  %v1575_v43 = vunpack.i.h.bf16 %v2562_v14 }
  0xba   :  { %v1518_v58 = vpop.permute.xlu0 %1517  ;;  %v1525_v8 = vunpack.i.h.bf16 %v1523_v12  ;;  %v1524_v50 = vunpack.i.l.bf16 %v1523_v12 }
  0xbb   :  { %v1520_v44 = vunpack.i.h.bf16 %v1518_v58  ;;  %v1519_v0 = vunpack.i.l.bf16 %v1518_v58 }
  0xbc   :  { %v914_v25 = vsel %vm905_vm7, %v897_v40, %v1524_v50  ;;  %v915_v26 = vsel %vm905_vm7, %v898_v3, %v1525_v8  ;;  %v1574_v8 = vunpack.i.l.bf16 %v2562_v14 }
  0xbd   :  { %v927_v6 = vsel %vm922_vm8, %v910_v61, %v1519_v0  ;;  %v928_v18 = vsel %vm922_vm8, %v911_v10, %v1520_v44 }
  0xbe   :  { %v944_v11 = vsel %vm939_vm9, %v927_v6, %v1529_v34  ;;  %v945_v36 = vsel %vm939_vm9, %v928_v18, %v1530_v62 }
  0xbf   :  { %v958_v51 = vpack.c.bf16 %v945_v36, %v944_v11 }
  0xc0   :  { %v1588_v55 = vpop.permute.xlu2 %1587 }
  0xc1   :  { %1369 = vmatmul.msk.bf16.vlgmr.msra.gmra.mxu1 %vm983_vm10, %v958_v51  ;;  %v1538_v47 = vpop.permute.xlu1 %1537  ;;  %v1590_v36 = vunpack.i.h.bf16 %v1588_v55  ;;  %v1589_v38 = vunpack.i.l.bf16 %v1588_v55 }
  0xc2   :  { %v1533_v54 = vpop.permute.xlu0 %1532  ;;  %v1540_v49 = vunpack.i.h.bf16 %v1538_v47  ;;  %v1539_v12 = vunpack.i.l.bf16 %v1538_v47 }
  0xc3   :  { %v1535_v60 = vunpack.i.h.bf16 %v1533_v54  ;;  %v1534_v9 = vunpack.i.l.bf16 %v1533_v54 }
  0xc4   :  { %v841_v62 = vsel %vm837_vm3, %v2382_v52, %v1540_v49  ;;  %v840_v34 = vsel %vm837_vm3, %v2378_v53, %v1539_v12 }
  0xc5   :  { %v931_v5 = vsel %vm922_vm8, %v914_v25, %v1534_v9  ;;  %v932_v63 = vsel %vm922_vm8, %v915_v26, %v1535_v60 }
  0xc6   :  { %v948_v2 = vsel %vm939_vm9, %v931_v5, %v1544_v13  ;;  %v949_v17 = vsel %vm939_vm9, %v932_v63, %v1545_v1 }
  0xc7   :  { %v960_v33 = vpack.c.bf16 %v949_v17, %v948_v2 }
  0xc8   :  { %v2576_v19 = vpop.permute.xlu2 %1602 }
  0xc9   :  { %1371 = vmatmul.msk.bf16.vlgmr.msra.gmra.mxu2 %vm983_vm10, %v960_v33  ;;  %v1553_v46 = vpop.permute.xlu1 %1552 }
  0xca   :  { %v1548_v4 = vpop.permute.xlu0 %1547  ;;  %v1555_v24 = vunpack.i.h.bf16 %v1553_v46  ;;  %v1554_v6 = vunpack.i.l.bf16 %v1553_v46  ;;  %v1605_v46 = vunpack.i.h.bf16 %v2576_v19 }
  0xcb   :  { %v1550_v22 = vunpack.i.h.bf16 %v1548_v4  ;;  %v1549_v48 = vunpack.i.l.bf16 %v1548_v4  ;;  %v1604_v4 = vunpack.i.l.bf16 %v2576_v19 }
  0xcc   :  { %v851_v51 = vsel %vm837_vm3, %v2421_v16, %v1555_v24  ;;  %v850_v27 = vsel %vm837_vm3, %v2417_v30, %v1554_v6 }
  0xcd   :  { %v858_v0 = vsel %vm854_vm4, %v841_v62, %v1550_v22  ;;  %v857_v61 = vsel %vm854_vm4, %v840_v34, %v1549_v48 }
  0xce   :  { %v875_v52 = vsel %vm871_vm5, %v858_v0, %v1560_v7  ;;  %v874_v18 = vsel %vm871_vm5, %v857_v61, %v1559_v20 }
  0xd0   :  { %v2588_v21 = vpop.permute.xlu2 %1617 }
  0xd1   :  { %v1568_v15 = vpop.permute.xlu1 %1567 }
  0xd2   :  { %v1563_v23 = vpop.permute.xlu0 %1562  ;;  %v1570_v10 = vunpack.i.h.bf16 %v1568_v15  ;;  %v1569_v41 = vunpack.i.l.bf16 %v1568_v15 }
  0xd3   :  { %v1565_v53 = vunpack.i.h.bf16 %v1563_v23  ;;  %v1564_v28 = vunpack.i.l.bf16 %v1563_v23 }
  0xd4   :  { %v891_v31 = vsel %vm888_vm6, %v874_v18, %v1569_v41  ;;  %v892_v11 = vsel %vm888_vm6, %v875_v52, %v1570_v10  ;;  %v1620_v52 = vunpack.i.h.bf16 %v2588_v21  ;;  %v1619_v18 = vunpack.i.l.bf16 %v2588_v21 }
  0xd5   :  { %v868_v47 = vsel %vm854_vm4, %v851_v51, %v1565_v53  ;;  %v867_v54 = vsel %vm854_vm4, %v850_v27, %v1564_v28 }
  0xd6   :  { %v885_v63 = vsel %vm871_vm5, %v868_v47, %v1575_v43  ;;  %v884_v2 = vsel %vm871_vm5, %v867_v54, %v1574_v8 }
  0xd8   :  { %v1633_v23 = vpop.permute.xlu2 %1632 }
  0xd9   :  { %v1583_v58 = vpop.permute.xlu1 %1582 }
  0xda   :  { %v1578_v44 = vpop.permute.xlu0 %1577  ;;  %v1585_v3 = vunpack.i.h.bf16 %v1583_v58  ;;  %v1584_v60 = vunpack.i.l.bf16 %v1583_v58 }
  0xdb   :  { %v1580_v56 = vunpack.i.h.bf16 %v1578_v44  ;;  %v1579_v35 = vunpack.i.l.bf16 %v1578_v44 }
  0xdc   :  { %v901_v17 = vsel %vm888_vm6, %v884_v2, %v1584_v60  ;;  %v902_v33 = vsel %vm888_vm6, %v885_v63, %v1585_v3 }
  0xdd   :  { %v908_v42 = vsel %vm905_vm7, %v891_v31, %v1579_v35  ;;  %v909_v57 = vsel %vm905_vm7, %v892_v11, %v1580_v56  ;;  %v1635_v31 = vunpack.i.h.bf16 %v1633_v23  ;;  %v1634_v11 = vunpack.i.l.bf16 %v1633_v23 }
  0xde   :  { %v925_v9 = vsel %vm922_vm8, %v908_v42, %v1589_v38  ;;  %v926_v16 = vsel %vm922_vm8, %v909_v57, %v1590_v36 }
  0xe0   :  { %v1648_v0 = vpop.permute.xlu2 %1647 }
  0xe1   :  { %v1598_v50 = vpop.permute.xlu1 %1597  ;;  %v1649_v47 = vunpack.i.l.bf16 %v1648_v0 }
  0xe2   :  { %v1600_v1 = vunpack.i.h.bf16 %v1598_v50  ;;  %v1599_v13 = vunpack.i.l.bf16 %v1598_v50  ;;  %v1593_v40 = vpop.permute.xlu0 %1592 }
  0xe3   :  { %v1595_v25 = vunpack.i.h.bf16 %v1593_v40  ;;  %v1594_v30 = vunpack.i.l.bf16 %v1593_v40 }
  0xe4   :  { %v942_v26 = vsel %vm939_vm9, %v925_v9, %v1599_v13  ;;  %v943_v14 = vsel %vm939_vm9, %v926_v16, %v1600_v1 }
  0xe5   :  { %v957_v5 = vpack.c.bf16 %v943_v14, %v942_v26  ;;  %v918_v55 = vsel %vm905_vm7, %v901_v17, %v1594_v30  ;;  %v919_v15 = vsel %vm905_vm7, %v902_v33, %v1595_v25 }
  0xe6   :  { %v935_v58 = vsel %vm922_vm8, %v918_v55, %v1604_v4  ;;  %v936_v62 = vsel %vm922_vm8, %v919_v15, %v1605_v46 }
  0xe7   :  { %1368 = vmatmul.msk.bf16.gmra.mxu0 %vm983_vm10, %v957_v5 }
  0xe8   :  { %v1663_v41 = vpop.permute.xlu2 %1662 }
  0xe9   :  { %v1613_v49 = vpop.permute.xlu1 %1612  ;;  %v1665_v40 = vunpack.i.h.bf16 %v1663_v41  ;;  %v1664_v3 = vunpack.i.l.bf16 %v1663_v41 }
  0xea   :  { %v1615_v12 = vunpack.i.h.bf16 %v1613_v49  ;;  %v1614_v22 = vunpack.i.l.bf16 %v1613_v49  ;;  %v1608_v48 = vpop.permute.xlu0 %1607 }
  0xeb   :  { %v1610_v56 = vunpack.i.h.bf16 %v1608_v48  ;;  %v1609_v35 = vunpack.i.l.bf16 %v1608_v48 }
  0xec   :  { %v952_v34 = vsel %vm939_vm9, %v935_v58, %v1614_v22  ;;  %v953_v7 = vsel %vm939_vm9, %v936_v62, %v1615_v12 }
  0xed   :  { %v962_v19 = vpack.c.bf16 %v953_v7, %v952_v34  ;;  %v845_v53 = vsel %vm837_vm3, %v2371_v45, %v1610_v56  ;;  %v844_v28 = vsel %vm837_vm3, %v2367_v39, %v1609_v35  ;;  %v1650_v45 = vunpack.i.h.bf16 %v1648_v0 }
  0xee   :  { %v862_v1 = vsel %vm854_vm4, %v845_v53, %v1620_v52  ;;  %v861_v13 = vsel %vm854_vm4, %v844_v28, %v1619_v18 }
  0xef   :  { %1373 = vmatmul.msk.bf16.vlgmr.msra.gmra.mxu3 %vm983_vm10, %v962_v19 }
  0xf0   :  { %v1678_v16 = vpop.permute.xlu2 %1677 }
  0xf1   :  { %v1628_v20 = vpop.permute.xlu1 %1627  ;;  %v1680_v46 = vunpack.i.h.bf16 %v1678_v16  ;;  %v1679_v4 = vunpack.i.l.bf16 %v1678_v16 }
  0xf2   :  { %v1623_v44 = vpop.permute.xlu0 %1622  ;;  %v1630_v38 = vunpack.i.h.bf16 %v1628_v20  ;;  %v1629_v42 = vunpack.i.l.bf16 %v1628_v20 }
  0xf3   :  { %v1625_v24 = vunpack.i.h.bf16 %v1623_v44  ;;  %v1624_v6 = vunpack.i.l.bf16 %v1623_v44 }
  0xf4   :  { %v879_v60 = vsel %vm871_vm5, %v862_v1, %v1630_v38 }
  0xf5   :  { %v849_v57 = vsel %vm837_vm3, %v2261_v32, %v1625_v24  ;;  %v848_v51 = vsel %vm837_vm3, %v2257_v29, %v1624_v6  ;;  %v878_v32 = vsel %vm871_vm5, %v861_v13, %v1629_v42 }
  0xf6   :  { %v866_v29 = vsel %vm854_vm4, %v849_v57, %v1635_v31  ;;  %v865_v9 = vsel %vm854_vm4, %v848_v51, %v1634_v11 }
  0xf8   :  { %v1693_v18 = vpop.permute.xlu2 %1692 }
  0xf9   :  { %v1643_v61 = vpop.permute.xlu1 %1642  ;;  %v1694_v38 = vunpack.i.l.bf16 %v1693_v18 }
  0xfa   :  { %v1638_v10 = vpop.permute.xlu0 %1637  ;;  %v1645_v43 = vunpack.i.h.bf16 %v1643_v61  ;;  %v1644_v21 = vunpack.i.l.bf16 %v1643_v61 }
  0xfb   :  { %v1640_v8 = vunpack.i.h.bf16 %v1638_v10  ;;  %v1639_v50 = vunpack.i.l.bf16 %v1638_v10 }
  0xfc   :  { %v882_v25 = vsel %vm871_vm5, %v865_v9, %v1644_v21  ;;  %v883_v30 = vsel %vm871_vm5, %v866_v29, %v1645_v43 }
  0xfd   :  { %v895_v26 = vsel %vm888_vm6, %v878_v32, %v1639_v50  ;;  %v896_v14 = vsel %vm888_vm6, %v879_v60, %v1640_v8 }
  0xfe   :  { %v912_v55 = vsel %vm905_vm7, %v895_v26, %v1649_v47  ;;  %v913_v15 = vsel %vm905_vm7, %v896_v14, %v1650_v45 }
 0x101   :  { %v1658_v36 = vpop.permute.xlu1 %1657 }
 0x102   :  { %v1653_v27 = vpop.permute.xlu0 %1652  ;;  %v1660_v5 = vunpack.i.h.bf16 %v1658_v36  ;;  %v1659_v63 = vunpack.i.l.bf16 %v1658_v36  ;;  %v1695_v36 = vunpack.i.h.bf16 %v1693_v18 }
 0x103   :  { %v1655_v54 = vunpack.i.h.bf16 %v1653_v27  ;;  %v1654_v39 = vunpack.i.l.bf16 %v1653_v27 }
 0x104   :  { %v929_v34 = vsel %vm922_vm8, %v912_v55, %v1659_v63  ;;  %v930_v7 = vsel %vm922_vm8, %v913_v15, %v1660_v5 }
 0x105   :  { %v899_v2 = vsel %vm888_vm6, %v882_v25, %v1654_v39  ;;  %v900_v17 = vsel %vm888_vm6, %v883_v30, %v1655_v54 }
 0x106   :  { %v916_v22 = vsel %vm905_vm7, %v899_v2, %v1664_v3  ;;  %v917_v48 = vsel %vm905_vm7, %v900_v17, %v1665_v40  ;;  %v1716_v2 = vld [vmem:[%s2755_s2] ss:$0 sm:$0xff] }
 0x109   :  { %v1673_v33 = vpop.permute.xlu1 %1672 }
 0x10a   :  { %v1675_v23 = vunpack.i.h.bf16 %v1673_v33  ;;  %v1674_v49 = vunpack.i.l.bf16 %v1673_v33  ;;  %v1668_v12 = vpop.permute.xlu0 %1667 }
 0x10b   :  { %v1670_v58 = vunpack.i.h.bf16 %v1668_v12  ;;  %v1669_v62 = vunpack.i.l.bf16 %v1668_v12 }
 0x10c   :  { %v933_v19 = vsel %vm922_vm8, %v916_v22, %v1674_v49  ;;  %v934_v20 = vsel %vm922_vm8, %v917_v48, %v1675_v23 }
 0x10d   :  { %v946_v44 = vsel %vm939_vm9, %v929_v34, %v1669_v62  ;;  %v947_v0 = vsel %vm939_vm9, %v930_v7, %v1670_v58  ;;  %v950_v61 = vsel %vm939_vm9, %v933_v19, %v1679_v4  ;;  %v951_v10 = vsel %vm939_vm9, %v934_v20, %v1680_v46 }
 0x10e   :  { %v959_v41 = vpack.c.bf16 %v947_v0, %v946_v44  ;;  %v961_v56 = vpack.c.bf16 %v951_v10, %v950_v61 }
 0x110   :  { %1370 = vmatmul.msk.bf16.gmra.mxu1 %vm983_vm10, %v959_v41  ;;  %1372 = vmatmul.msk.bf16.gmra.mxu2 %vm983_vm10, %v961_v56 }
 0x111   :  { %v1688_v35 = vpop.permute.xlu1 %1687 }
 0x112   :  { %v1683_v24 = vpop.permute.xlu0 %1682  ;;  %v1690_v53 = vunpack.i.h.bf16 %v1688_v35  ;;  %v1689_v28 = vunpack.i.l.bf16 %v1688_v35 }
 0x113   :  { %v1685_v6 = vunpack.i.h.bf16 %v1683_v24  ;;  %v1684_v52 = vunpack.i.l.bf16 %v1683_v24 }
 0x115   :  { %v853_v31 = vsel %vm837_vm3, %v2412_v59, %v1685_v6  ;;  %v852_v11 = vsel %vm837_vm3, %v2408_v37, %v1684_v52  ;;  %v1708_v59 = vpop.permute.xlu2 %1707 }
 0x116   :  { %v869_v42 = vsel %vm854_vm4, %v852_v11, %v1689_v28  ;;  %v870_v57 = vsel %vm854_vm4, %v853_v31, %v1690_v53  ;;  %v1710_v39 = vunpack.i.h.bf16 %v1708_v59  ;;  %v1709_v1 = vunpack.i.l.bf16 %v1708_v59 }
 0x117   :  { %v887_v8 = vsel %vm871_vm5, %v870_v57, %v1695_v36  ;;  %v886_v50 = vsel %vm871_vm5, %v869_v42, %v1694_v38 }
 0x119   :  { %v1703_v27 = vpop.permute.xlu1 %1702 }
 0x11a   :  { %v1698_v51 = vpop.permute.xlu0 %1697  ;;  %v1705_v45 = vunpack.i.h.bf16 %v1703_v27  ;;  %v1704_v47 = vunpack.i.l.bf16 %v1703_v27 }
 0x11b   :  { %v1700_v43 = vunpack.i.h.bf16 %v1698_v51  ;;  %v1699_v21 = vunpack.i.l.bf16 %v1698_v51 }
 0x11d   :  { %v903_v54 = vsel %vm888_vm6, %v886_v50, %v1699_v21  ;;  %v904_v37 = vsel %vm888_vm6, %v887_v8, %v1700_v43 }
 0x11e   :  { %v920_v13 = vsel %vm905_vm7, %v903_v54, %v1704_v47  ;;  %v921_v40 = vsel %vm905_vm7, %v904_v37, %v1705_v45 }
 0x11f   :  { %v937_v29 = vsel %vm922_vm8, %v920_v13, %v1709_v1  ;;  %v938_v9 = vsel %vm922_vm8, %v921_v40, %v1710_v39  ;;  %v1021_v26 = vpop.f32.mrf.mxu0 }
 0x120   :  { %v1022_v55 = vadd.f32 %v1716_v2, %v1021_v26 }
 0x122   :  { %v1713_v3 = vpop.permute.xlu0 %1712 }
 0x123   :  { %v1715_v32 = vunpack.i.h.bf16 %v1713_v3  ;;  %v1714_v60 = vunpack.i.l.bf16 %v1713_v3 }
 0x125   :  { %v954_v16 = vsel %vm939_vm9, %v937_v29, %v1714_v60  ;;  %v955_v25 = vsel %vm939_vm9, %v938_v9, %v1715_v32 }
 0x126   :  { %v963_v30 = vpack.c.bf16 %v955_v25, %v954_v16 }
 0x127   :  { %v1023_v14 = vpop.f32.mrf.mxu0 }
 0x128   :  { %1374 = vmatmul.msk.bf16.gmra.mxu3 %vm983_vm10, %v963_v30  ;;  %v1024_v33 = vadd.f32 %v1716_v2, %v1023_v14 }
 0x12a   :  { %v1061_v23 = vadd.f32 %v1024_v33, %v1022_v55 }
 0x13e   :  { %v1031_v5 = vpop.f32.mrf.mxu1 }
 0x13f   :  { %v1032_v58 = vadd.f32 %v1716_v2, %v1031_v5 }
 0x146   :  { %v1033_v17 = vpop.f32.mrf.mxu1 }
 0x147   :  { %v1034_v7 = vadd.f32 %v1716_v2, %v1033_v17 }
 0x14c   :  { %v1041_v46 = vpop.f32.mrf.mxu2 }
 0x14d   :  { %v1042_v35 = vadd.f32 %v1716_v2, %v1041_v46 }
 0x154   :  { %v1043_v62 = vpop.f32.mrf.mxu2 }
 0x155   :  { %v1044_v6 = vadd.f32 %v1716_v2, %v1043_v62 }
 0x164   :  { %v1026_v63 = vpop.f32.mrf.mxu0 }
 0x165   :  { %v1027_v15 = vadd.f32 %v1716_v2, %v1026_v63 }
 0x167   :  { %v1062_v12 = vadd.f32 %v1061_v23, %v1027_v15 }
 0x16c   :  { %v1028_v4 = vpop.f32.mrf.mxu0 }
 0x16d   :  { %v1029_v49 = vadd.f32 %v1716_v2, %v1028_v4 }
 0x16f   :  { %v1063_v48 = vadd.f32 %v1062_v12, %v1029_v49 }
 0x171   :  { %v1064_v34 = vadd.f32 %v1063_v48, %v1032_v58 }
 0x172   :  { %v1051_v10 = vpop.f32.mrf.mxu3 }
 0x173   :  { %v1065_v44 = vadd.f32 %v1064_v34, %v1034_v7  ;;  %v1052_v42 = vadd.f32 %v1716_v2, %v1051_v10 }
 0x17a   :  { %v1053_v18 = vpop.f32.mrf.mxu3 }
 0x17b   :  { %v1054_v51 = vadd.f32 %v1716_v2, %v1053_v18 }
 0x18d   :  { %v1036_v22 = vpop.f32.mrf.mxu1 }
 0x18e   :  { %v1037_v19 = vadd.f32 %v1716_v2, %v1036_v22 }
 0x190   :  { %v1066_v61 = vadd.f32 %v1065_v44, %v1037_v19 }
 0x193   :  { %v1046_v41 = vpop.f32.mrf.mxu2 }
 0x194   :  { %v1047_v28 = vadd.f32 %v1716_v2, %v1046_v41 }
 0x195   :  { %v1038_v20 = vpop.f32.mrf.mxu1 }
 0x196   :  { %v1039_v0 = vadd.f32 %v1716_v2, %v1038_v20 }
 0x198   :  { %v1067_v56 = vadd.f32 %v1066_v61, %v1039_v0 }
 0x19a   :  { %v1068_v24 = vadd.f32 %v1067_v56, %v1042_v35 }
 0x19b   :  { %v1048_v53 = vpop.f32.mrf.mxu2 }
 0x19c   :  { %v1069_v52 = vadd.f32 %v1068_v24, %v1044_v6  ;;  %v1049_v31 = vadd.f32 %v1716_v2, %v1048_v53 }
 0x19e   :  { %v1070_v11 = vadd.f32 %v1069_v52, %v1047_v28 }
 0x1a0   :  { %v1071_v36 = vadd.f32 %v1070_v11, %v1049_v31 }
 0x1a2   :  { %v1072_v57 = vadd.f32 %v1071_v36, %v1052_v42 }
 0x1a4   :  { %v1073_v43 = vadd.f32 %v1072_v57, %v1054_v51 }
 0x1ab   :  { %v1056_v38 = vpop.f32.mrf.mxu3 }
 0x1ac   :  { %v1057_v27 = vadd.f32 %v1716_v2, %v1056_v38 }
 0x1ae   :  { %v1074_v8 = vadd.f32 %v1073_v43, %v1057_v27 }
 0x1b3   :  { %v1058_v21 = vpop.f32.mrf.mxu3 }
 0x1b4   :  { %v1059_v50 = vadd.f32 %v1716_v2, %v1058_v21 }
 0x1b6   :  { %v1075_v45 = vadd.f32 %v1074_v8, %v1059_v50 }
 0x1b8   :  { %v1076_v47 = vrot.slane %v1075_v45, 4 }
 0x1ba   :  { %v1077_v59 = vadd.f32 %v1076_v47, %v1075_v45 }
 0x1bc   :  { %v1078_v54 = vrot.slane %v1077_v59, 2 }
 0x1be   :  { %v1079_v37 = vadd.f32 %v1078_v54, %v1077_v59 }
 0x1c0   :  { %v1080_v39 = vrot.slane %v1079_v37, 1 }
 0x1c2   :  { %v1081_v1 = vadd.f32 %v1080_v39, %v1079_v37  ;;  %v1137_v37 = vld [vmem:[%s2756_s3] sm:$0x1]  ;;  %s1754_s3 = smov [#allocation2]  }
 0x1c4   :  { %v1082_v13 = vmul.f32 0.0078125, %v1081_v1 }
 0x1c6   :  { %v2676_v40 = vsub.f32 %v1022_v55, %v1082_v13  ;;  %v2678_v3 = vsub.f32 %v1024_v33, %v1082_v13  ;;  %v2680_v32 = vsub.f32 %v1027_v15, %v1082_v13  ;;  %v2686_v9 = vsub.f32 %v1029_v49, %v1082_v13 }
 0x1c7   :  { %v2688_v16 = vsub.f32 %v1032_v58, %v1082_v13  ;;  %v2692_v26 = vsub.f32 %v1034_v7, %v1082_v13  ;;  %v2696_v63 = vsub.f32 %v1037_v19, %v1082_v13  ;;  %v1090_v33 = vsub.f32 %v1039_v0, %v1082_v13 }
 0x1c8   :  { %v1099_v60 = vmul.f32 %v2676_v40, %v2676_v40  ;;  %v1100_v29 = vmul.f32 %v2678_v3, %v2678_v3  ;;  %v1101_v25 = vmul.f32 %v2680_v32, %v2680_v32  ;;  %v1102_v14 = vmul.f32 %v2686_v9, %v2686_v9 }
 0x1c9   :  { %v1103_v2 = vmul.f32 %v2688_v16, %v2688_v16  ;;  %v1104_v46 = vmul.f32 %v2692_v26, %v2692_v26  ;;  %v1091_v55 = vsub.f32 %v1042_v35, %v1082_v13  ;;  %v1105_v15 = vmul.f32 %v2696_v63, %v2696_v63 }
 0x1ca   :  { %v1115_v30 = vadd.f32 %v1100_v29, %v1099_v60  ;;  %v1092_v49 = vsub.f32 %v1044_v6, %v1082_v13  ;;  %v1106_v12 = vmul.f32 %v1090_v33, %v1090_v33  ;;  %v1093_v48 = vsub.f32 %v1047_v28, %v1082_v13 }
 0x1cb   :  { %v1107_v58 = vmul.f32 %v1091_v55, %v1091_v55  ;;  %v1094_v34 = vsub.f32 %v1049_v31, %v1082_v13  ;;  %v1095_v20 = vsub.f32 %v1052_v42, %v1082_v13  ;;  %v1096_v61 = vsub.f32 %v1054_v51, %v1082_v13 }
 0x1cc   :  { %v1116_v5 = vadd.f32 %v1115_v30, %v1101_v25  ;;  %v1108_v7 = vmul.f32 %v1092_v49, %v1092_v49  ;;  %v1109_v44 = vmul.f32 %v1093_v48, %v1093_v48  ;;  %v1097_v56 = vsub.f32 %v1057_v27, %v1082_v13 }
 0x1cd   :  { %v1110_v10 = vmul.f32 %v1094_v34, %v1094_v34  ;;  %v1111_v35 = vmul.f32 %v1095_v20, %v1095_v20  ;;  %v1098_v52 = vsub.f32 %v1059_v50, %v1082_v13  ;;  %v1112_v18 = vmul.f32 %v1096_v61, %v1096_v61 }
 0x1ce   :  { %v1117_v17 = vadd.f32 %v1116_v5, %v1102_v14  ;;  %v1113_v53 = vmul.f32 %v1097_v56, %v1097_v56  ;;  %v1717_v5 = vld [vmem:[%s2757_s4] ss:$0 sm:$0xff]  ;;  %s1345_s4 = sshll.u32 %s1754_s3, 4  ;;  %s1346_s4 = int_to_ptr.vmem [resolvable:$true] %s1345_s4 }
 0x1cf   :  { %v1114_v28 = vmul.f32 %v1098_v52, %v1098_v52 }
 0x1d0   :  { %v1118_v4 = vadd.f32 %v1117_v17, %v1103_v2 }
 0x1d2   :  { %v1119_v23 = vadd.f32 %v1118_v4, %v1104_v46 }
 0x1d4   :  { %v1120_v22 = vadd.f32 %v1119_v23, %v1105_v15 }
 0x1d6   :  { %v1121_v62 = vadd.f32 %v1120_v22, %v1106_v12 }
 0x1d8   :  { %v1122_v19 = vadd.f32 %v1121_v62, %v1107_v58 }
 0x1da   :  { %v1123_v0 = vadd.f32 %v1122_v19, %v1108_v7 }
 0x1dc   :  { %v1124_v41 = vadd.f32 %v1123_v0, %v1109_v44 }
 0x1de   :  { %v1125_v24 = vadd.f32 %v1124_v41, %v1110_v10 }
 0x1e0   :  { %v1126_v6 = vadd.f32 %v1125_v24, %v1111_v35 }
 0x1e2   :  { %v1127_v11 = vadd.f32 %v1126_v6, %v1112_v18 }
 0x1e4   :  { %v1128_v36 = vadd.f32 %v1127_v11, %v1113_v53 }
 0x1e6   :  { %v1129_v38 = vadd.f32 %v1128_v36, %v1114_v28 }
 0x1e8   :  { %v1130_v31 = vrot.slane %v1129_v38, 4 }
 0x1ea   :  { %v1131_v57 = vadd.f32 %v1130_v31, %v1129_v38 }
 0x1ec   :  { %v1132_v43 = vrot.slane %v1131_v57, 2 }
 0x1ee   :  { %v1133_v42 = vadd.f32 %v1132_v43, %v1131_v57 }
 0x1f0   :  { %v1134_v21 = vrot.slane %v1133_v42, 1 }
 0x1f2   :  { %v1135_v8 = vadd.f32 %v1134_v21, %v1133_v42 }
 0x1f4   :  { %v1136_v51 = vmul.f32 0.0078125, %v1135_v8 }
 0x1f6   :  { %v1138_v45 = vadd.f32 1e-05, %v1136_v51 }
 0x1f8   :  { %1718 = vrsqrt.f32 %v1138_v45  ;;  %vm1145_vm12 = vweird.f32 %v1138_v45 }
 0x1fe   :  { %v1719_v27 = vpop.eup %1718 }
 0x1ff   :  { %v1140_v47 = vmul.f32 %v1719_v27, %v1138_v45  ;;  %vm1146_vm11 = vweird.f32 %v1719_v27 }
 0x200   :  { %vm1147_vm13 = vmor %vm1145_vm12, %vm1146_vm11 }
 0x201   :  { %v1141_v59 = vmul.f32 %v1719_v27, %v1140_v47 }
 0x203   :  { %v1142_v50 = vmul.f32 0.5, %v1141_v59 }
 0x205   :  { %v1143_v54 = vsub.f32 1.5, %v1142_v50 }
 0x207   :  { %v1144_v39 = vmul.f32 %v1719_v27, %v1143_v54 }
 0x209   :  { %v1148_v1 = vsel %vm1147_vm13, %v1719_v27, %v1144_v39 }
 0x20a   :  { %v1149_v13 = vmul.f32 %v1148_v1, %v1137_v37 }
 0x20c   :  { %v1151_v60 = vperm.slane %v1149_v13, 0 }
 0x20e   :  { %v1153_v29 = vmul.f32 %v1151_v60, %v2676_v40  ;;  %v1154_v25 = vmul.f32 %v1151_v60, %v2678_v3  ;;  %v1155_v30 = vmul.f32 %v1151_v60, %v2680_v32  ;;  %v1156_v14 = vmul.f32 %v1151_v60, %v2686_v9 }
 0x20f   :  { %v1157_v2 = vmul.f32 %v1151_v60, %v2688_v16  ;;  %v1158_v17 = vmul.f32 %v1151_v60, %v2692_v26  ;;  %v1159_v46 = vmul.f32 %v1151_v60, %v2696_v63  ;;  %v1160_v4 = vmul.f32 %v1151_v60, %v1090_v33 }
 0x210   :  { %v1161_v15 = vmul.f32 %v1151_v60, %v1091_v55  ;;  %v1162_v23 = vmul.f32 %v1151_v60, %v1092_v49  ;;  %v1163_v40 = vmul.f32 %v1151_v60, %v1093_v48  ;;  %v1164_v12 = vmul.f32 %v1151_v60, %v1094_v34 }
 0x211   :  { %v1165_v3 = vmul.f32 %v1151_v60, %v1095_v20  ;;  %v1166_v22 = vmul.f32 %v1151_v60, %v1096_v61  ;;  %v1167_v32 = vmul.f32 %v1151_v60, %v1097_v56  ;;  %v1168_v58 = vmul.f32 %v1151_v60, %v1098_v52 }
 0x212   :  { %v1173_v9 = vadd.f32 %v1717_v5, %v1153_v29  ;;  %v1174_v62 = vadd.f32 %v1717_v5, %v1154_v25  ;;  %v1175_v7 = vadd.f32 %v1717_v5, %v1155_v30  ;;  %v1176_v19 = vadd.f32 %v1717_v5, %v1156_v14 }
 0x213   :  { %v1177_v44 = vadd.f32 %v1717_v5, %v1157_v2  ;;  %v1178_v0 = vadd.f32 %v1717_v5, %v1158_v17  ;;  %v1179_v16 = vadd.f32 %v1717_v5, %v1159_v46  ;;  %v1180_v10 = vadd.f32 %v1717_v5, %v1160_v4 }
 0x214   :  { %v1181_v26 = vadd.f32 %v1717_v5, %v1161_v15  ;;  %v1182_v41 = vadd.f32 %v1717_v5, %v1162_v23  ;;  %v1183_v63 = vadd.f32 %v1717_v5, %v1163_v40  ;;  %v1184_v33 = vadd.f32 %v1717_v5, %v1164_v12 }
 0x215   :  { %v1185_v55 = vadd.f32 %v1717_v5, %v1165_v3  ;;  %v1186_v49 = vadd.f32 %v1717_v5, %v1166_v22  ;;  %v1187_v48 = vadd.f32 %v1717_v5, %v1167_v32  ;;  %v1188_v34 = vadd.f32 %v1717_v5, %v1168_v58 }
 0x216   :  { %v1189_v20 = vmax.f32 %v1173_v9, %v1174_v62  ;;  %v1209_v61 = vmax.f32 %v1174_v62, %v1175_v7  ;;  %v1228_v56 = vmax.f32 %v1176_v19, %v1177_v44  ;;  %v1247_v35 = vmax.f32 %v1178_v0, %v1179_v16 }
 0x217   :  { %v1266_v24 = vmax.f32 %v1181_v26, %v1182_v41  ;;  %v1284_v52 = vmax.f32 %v1182_v41, %v1183_v63  ;;  %v1303_v18 = vmax.f32 %v1184_v33, %v1185_v55  ;;  %v1322_v6 = vmax.f32 %v1186_v49, %v1187_v48 }
 0x218   :  { %v1191_v53 = vrot.slane %v1189_v20, 1  ;;  %v1194_v11 = vrot.slane %v1189_v20, 2  ;;  %v1210_v28 = vmax.f32 %v1209_v61, %v1176_v19  ;;  %v1229_v36 = vmax.f32 %v1228_v56, %v1178_v0 }
 0x219   :  { %v1248_v38 = vmax.f32 %v1247_v35, %v1180_v10  ;;  %v1268_v31 = vrot.slane %v1266_v24, 1  ;;  %v1271_v57 = vrot.slane %v1266_v24, 2  ;;  %v1285_v43 = vmax.f32 %v1284_v52, %v1184_v33 }
 0x21a   :  { %v1193_v42 = vmax.f32 %v1189_v20, %v1191_v53  ;;  %v1212_v21 = vrot.slane %v1210_v28, 1  ;;  %v1215_v8 = vrot.slane %v1210_v28, 2  ;;  %v1231_v51 = vrot.slane %v1229_v36, 1 }
 0x21b   :  { %v1234_v45 = vrot.slane %v1229_v36, 2  ;;  %v1250_v27 = vrot.slane %v1248_v38, 1  ;;  %v1253_v47 = vrot.slane %v1248_v38, 2  ;;  %v1270_v59 = vmax.f32 %v1266_v24, %v1268_v31 }
 0x21c   :  { %v1196_v50 = vmax.f32 %v1193_v42, %v1194_v11  ;;  %v1214_v54 = vmax.f32 %v1210_v28, %v1212_v21  ;;  %v1233_v37 = vmax.f32 %v1229_v36, %v1231_v51  ;;  %v1287_v39 = vrot.slane %v1285_v43, 1 }
 0x21d   :  { %v1252_v1 = vmax.f32 %v1248_v38, %v1250_v27  ;;  %v1273_v13 = vmax.f32 %v1270_v59, %v1271_v57  ;;  %v1290_v60 = vrot.slane %v1285_v43, 2  ;;  %v1304_v29 = vmax.f32 %v1303_v18, %v1186_v49 }
 0x21e   :  { %v1217_v25 = vmax.f32 %v1214_v54, %v1215_v8  ;;  %v1236_v30 = vmax.f32 %v1233_v37, %v1234_v45  ;;  %v1289_v14 = vmax.f32 %v1285_v43, %v1287_v39  ;;  %v1323_v5 = vmax.f32 %v1322_v6, %v1188_v34 }
 0x21f   :  { %v1255_v2 = vmax.f32 %v1252_v1, %v1253_v47  ;;  %v1275_v17 = vrot.slane %v1273_v13, 1  ;;  %v1277_v46 = vrot.slane %v1273_v13, 2  ;;  %v1279_v4 = vsel %vm1202_vm14, %v1270_v59, %v1273_v13 }
 0x220   :  { %v1238_v15 = vrot.slane %v1236_v30, 1  ;;  %v1242_v23 = vsel %vm1202_vm14, %v1233_v37, %v1236_v30  ;;  %v1292_v40 = vmax.f32 %v1289_v14, %v1290_v60  ;;  %v1306_v12 = vrot.slane %v1304_v29, 1 }
 0x221   :  { %v1257_v3 = vrot.slane %v1255_v2, 1  ;;  %v1259_v22 = vrot.slane %v1255_v2, 2  ;;  %v1261_v32 = vsel %vm1202_vm14, %v1252_v1, %v1255_v2  ;;  %v1280_v58 = vsel %vm1008_vm2, %v1279_v4, %v1275_v17 }
 0x222   :  { %v1281_v9 = vsel %vm1205_vm15, %v1280_v58, %v1277_v46  ;;  %v1294_v62 = vrot.slane %v1292_v40, 1  ;;  %v1296_v7 = vrot.slane %v1292_v40, 2  ;;  %v1298_v19 = vsel %vm1202_vm14, %v1289_v14, %v1292_v40 }
 0x223   :  { %v1262_v44 = vsel %vm1008_vm2, %v1261_v32, %v1257_v3  ;;  %1283 = vst.msk [vmem:[#allocation2 + $0x10] sm:$0xf] %vm1207_vm0, %v1281_v9  ;;  %v1308_v0 = vmax.f32 %v1304_v29, %v1306_v12  ;;  %v1309_v16 = vrot.slane %v1304_v29, 2  ;;  %v1325_v10 = vrot.slane %v1323_v5, 1 }
 0x224   :  { %v1299_v26 = vsel %vm1008_vm2, %v1298_v19, %v1294_v62  ;;  %v1328_v41 = vrot.slane %v1323_v5, 2  ;;  %v1198_v63 = vrot.slane %v1196_v50, 1  ;;  %v1200_v33 = vrot.slane %v1196_v50, 2 }
 0x225   :  { %v1300_v55 = vsel %vm1205_vm15, %v1299_v26, %v1296_v7  ;;  %v1311_v49 = vmax.f32 %v1308_v0, %v1309_v16  ;;  %v1327_v48 = vmax.f32 %v1323_v5, %v1325_v10  ;;  %v1203_v34 = vsel %vm1202_vm14, %v1193_v42, %v1196_v50 }
 0x226   :  { %1302 = vst.msk [vmem:[#allocation2 + $0x14] sm:$0xf] %vm1207_vm0, %v1300_v55  ;;  %v1204_v20 = vsel %vm1008_vm2, %v1203_v34, %v1198_v63  ;;  %v1219_v61 = vrot.slane %v1217_v25, 1  ;;  %v1221_v56 = vrot.slane %v1217_v25, 2  ;;  %v1223_v35 = vsel %vm1202_vm14, %v1214_v54, %v1217_v25 }
 0x227   :  { %v1313_v24 = vrot.slane %v1311_v49, 1  ;;  %v1315_v52 = vrot.slane %v1311_v49, 2  ;;  %v1317_v18 = vsel %vm1202_vm14, %v1308_v0, %v1311_v49  ;;  %v1330_v6 = vmax.f32 %v1327_v48, %v1328_v41 }
 0x228   :  { %v1206_v53 = vsel %vm1205_vm15, %v1204_v20, %v1200_v33  ;;  %v1224_v11 = vsel %vm1008_vm2, %v1223_v35, %v1219_v61  ;;  %v1240_v28 = vrot.slane %v1236_v30, 2  ;;  %v1243_v36 = vsel %vm1008_vm2, %v1242_v23, %v1238_v15 }
 0x229   :  { %v1318_v38 = vsel %vm1008_vm2, %v1317_v18, %v1313_v24  ;;  %v1332_v31 = vrot.slane %v1330_v6, 1  ;;  %v1334_v57 = vrot.slane %v1330_v6, 2  ;;  %v1336_v43 = vsel %vm1202_vm14, %v1327_v48, %v1330_v6  ;;  %1208 = vst.msk [vmem:[#allocation2] sm:$0xf] %vm1207_vm0, %v1206_v53 }
 0x22a   :  { %v1319_v42 = vsel %vm1205_vm15, %v1318_v38, %v1315_v52  ;;  %v1225_v21 = vsel %vm1205_vm15, %v1224_v11, %v1221_v56  ;;  %v1244_v51 = vsel %vm1205_vm15, %v1243_v36, %v1240_v28  ;;  %v1263_v27 = vsel %vm1205_vm15, %v1262_v44, %v1259_v22 }
 0x22b   :  { %1321 = vst.msk [vmem:[#allocation2 + $0x18] sm:$0xf] %vm1207_vm0, %v1319_v42  ;;  %v1337_v8 = vsel %vm1008_vm2, %v1336_v43, %v1332_v31 }
 0x22c   :  { %v1338_v45 = vsel %vm1205_vm15, %v1337_v8, %v1334_v57  ;;  %1227 = vst.msk [vmem:[#allocation2 + $0x4] sm:$0xf] %vm1207_vm0, %v1225_v21 }
 0x22d   :  { %1340 = vst.msk [vmem:[#allocation2 + $0x1c] sm:$0xf] %vm1207_vm0, %v1338_v45 }
 0x22e   :  { %1246 = vst.msk [vmem:[#allocation2 + $0x8] sm:$0xf] %vm1207_vm0, %v1244_v51 }
 0x22f   :  { %1265 = vst.msk [vmem:[#allocation2 + $0xc] sm:$0xf] %vm1207_vm0, %v1263_v27 }
 0x230   :  { %1353 = dma.vmem_to_hbm [thread:$0]  %s1346_s4, 512, %s1348_s29, [#allocation3], %s1755_s5, %s1755_s5, %s1746_s17  }
 0x231   :  { %1744 = dma.done.wait [#allocation3], 512  }
 0x232   :  { %1745 = vsyncadd [#allocation3], 4294966784 }
 0x233   :  { %1358 = vsyncpa [#allocation3], 1 }

</bundles_post_ra>
